<compile_context>
chip_gen: v7x
topology: tpu7x:2x2x1
jax: 0.10.0
libtpu: 0.0.40
codegen_flags: <defaults>
</compile_context>

<pallas_src>
import functools

import jax
import jax.numpy as jnp
from jax.experimental import pallas as pl
from jax.experimental.pallas import tpu as pltpu


# ----------------------------- fused Transformer1d kernel (one grid step = one batch element) -----------------------------

def _transformer1d_kernel(
    x_ref, gn_g_ref, gn_b_ref, w_in_ref, b_in_ref,
    ln_g_ref, ln_b_ref, lnc_g_ref, lnc_b_ref,
    wq_ref, wkv_ref, wo_ref, bo_ref,
    fw1_ref, fb1_ref, fw2_ref, fb2_ref,
    w_out_ref, b_out_ref, o_ref,
    *, num_layers, num_heads, head_features, num_groups, gn_eps, ln_eps):
    f32 = jnp.float32
    scale = head_features ** -0.5
    D = head_features
    mid = num_heads * head_features

    x = x_ref[0]                                     # (C, T)
    C, T = x.shape
    cg = C // num_groups

    # --- GroupNorm(32, eps=1e-6, affine) over (C, T) ---
    xg = x.reshape(num_groups, cg * T)
    mu = jnp.mean(xg, axis=-1, keepdims=True)
    xc = xg - mu
    var = jnp.mean(xc * xc, axis=-1, keepdims=True)
    xn = (xc * jax.lax.rsqrt(var + gn_eps)).reshape(C, T)
    xn = xn * gn_g_ref[...] + gn_b_ref[...]          # (C, T) * (C, 1)

    # --- Conv1d(k=1) fused with rearrange 'b c t -> b t c': h[t, o] = sum_c xn[c, t] * W[o, c] + b[o] ---
    h = jax.lax.dot_general(xn, w_in_ref[...], (((0,), (1,)), ((), ())),
                            preferred_element_type=f32) + b_in_ref[...]      # (T, C)

    def layer_norm(z, g, b):
        m = jnp.mean(z, axis=-1, keepdims=True)
        zc = z - m
        v = jnp.mean(zc * zc, axis=-1, keepdims=True)
        return zc * jax.lax.rsqrt(v + ln_eps) * g + b

    for l in range(num_layers):
        # --- self-attention + residual ---
        xq = layer_norm(h, ln_g_ref[l], ln_b_ref[l])        # norm (query source)
        xk = layer_norm(h, lnc_g_ref[l], lnc_b_ref[l])      # norm_context (key/value source)
        # scale folded into q (off the (T, T) sim matrix); no bias for q / kv projections
        q = jax.lax.dot_general(xq, wq_ref[l], (((1,), (1,)), ((), ())),
                                preferred_element_type=f32) * scale          # (T, mid)
        kv = jax.lax.dot_general(xk, wkv_ref[l], (((1,), (1,)), ((), ())),
                                 preferred_element_type=f32)                 # (T, 2*mid)
        k = kv[:, :mid]
        v = kv[:, mid:]
        wo = wo_ref[l]                                                       # (C, mid)
        # residual and out-projection bias fused into the accumulation
        a = h + bo_ref[l]                                                    # (T, C)
        for hh in range(num_heads):
            sl = slice(hh * D, (hh + 1) * D)
            qh, kh, vh = q[:, sl], k[:, sl], v[:, sl]                        # (T, D)
            sim = jax.lax.dot_general(qh, kh, (((1,), (1,)), ((), ())),
                                      preferred_element_type=f32)            # (T, T)
            m = jnp.max(sim, axis=-1, keepdims=True)
            e = jnp.exp(sim - m)
            attn = e / jnp.sum(e, axis=-1, keepdims=True)
            oh = jnp.dot(attn, vh, preferred_element_type=f32)               # (T, D)
            a = a + jax.lax.dot_general(oh, wo[:, sl], (((1,), (1,)), ((), ())),
                                        preferred_element_type=f32)          # (T, C)
        h = a

        # --- feed-forward + residual (GELU fused between the two matmuls) ---
        f1 = jax.lax.dot_general(h, fw1_ref[l], (((1,), (1,)), ((), ())),
                                 preferred_element_type=f32) + fb1_ref[l]    # (T, ff)
        f1 = jax.nn.gelu(f1, approximate=True)
        h = h + jax.lax.dot_general(f1, fw2_ref[l], (((1,), (1,)), ((), ())),
                                    preferred_element_type=f32) + fb2_ref[l]  # (T, C)

    # --- rearrange 'b t c -> b c t' fused with Conv1d(k=1): out[o, t] = sum_c W[o, c] * h[t, c] + b[o] ---
    out = jax.lax.dot_general(w_out_ref[...], h, (((1,), (1,)), ((), ())),
                              preferred_element_type=f32) + b_out_ref[...]   # (C, T)
    o_ref[0] = out.astype(o_ref.dtype)


def transformer1d_forward(x, params, *, num_heads, head_features):
    """x: (B, C, T) f32.  params: dict (torch (out, in) weight layout).  Returns (B, C, T)."""
    f32 = jnp.float32
    x = jnp.asarray(x, f32)
    B, C, T = x.shape
    L = len(params["blocks"])
    mid = num_heads * head_features
    ff = params["blocks"][0]["ff_w1"].shape[0]

    def st(name, reshape=None):
        arrs = [jnp.asarray(blk[name], f32) for blk in params["blocks"]]
        if reshape is not None:
            arrs = [a.reshape(reshape) for a in arrs]
        return jnp.stack(arrs, axis=0)

    gn_g = jnp.asarray(params["gn_g"], f32).reshape(C, 1)
    gn_b = jnp.asarray(params["gn_b"], f32).reshape(C, 1)
    w_in = jnp.asarray(params["conv_in_w"], f32)                     # (C, C)
    b_in = jnp.asarray(params["conv_in_b"], f32).reshape(1, C)
    w_out = jnp.asarray(params["conv_out_w"], f32)                   # (C, C)
    b_out = jnp.asarray(params["conv_out_b"], f32).reshape(C, 1)

    ln_g, ln_b = st("ln_g", (1, C)), st("ln_b", (1, C))
    lnc_g, lnc_b = st("lnc_g", (1, C)), st("lnc_b", (1, C))
    wq, wkv, wo = st("wq"), st("wkv"), st("wo")
    bo = st("bo", (1, C))
    fw1, fb1 = st("ff_w1"), st("ff_b1", (1, ff))
    fw2, fb2 = st("ff_w2"), st("ff_b2", (1, C))

    def full(shape):
        nd = len(shape)
        return pl.BlockSpec(shape, lambda b, _nd=nd: (0,) * _nd)

    out = pl.pallas_call(
        functools.partial(
            _transformer1d_kernel,
            num_layers=L, num_heads=num_heads, head_features=head_features,
            num_groups=32, gn_eps=1e-6, ln_eps=1e-5),
        out_shape=jax.ShapeDtypeStruct((B, C, T), f32),
        grid=(B,),
        in_specs=[
            pl.BlockSpec((1, C, T), lambda b: (b, 0, 0)),
            full((C, 1)), full((C, 1)),                    # GroupNorm gamma / beta
            full((C, C)), full((1, C)),                    # conv_in
            full((L, 1, C)), full((L, 1, C)),              # LayerNorm (query)
            full((L, 1, C)), full((L, 1, C)),              # LayerNorm (context)
            full((L, mid, C)), full((L, 2 * mid, C)),      # wq, wkv
            full((L, C, mid)), full((L, 1, C)),            # wo, bo
            full((L, ff, C)), full((L, 1, ff)),            # ff_w1, ff_b1
            full((L, C, ff)), full((L, 1, C)),             # ff_w2, ff_b2
            full((C, C)), full((C, 1)),                    # conv_out
        ],
        out_specs=pl.BlockSpec((1, C, T), lambda b: (b, 0, 0)),
        compiler_params=pltpu.CompilerParams(dimension_semantics=("parallel",)),
    )(x, gn_g, gn_b, w_in, b_in,
      ln_g, ln_b, lnc_g, lnc_b,
      wq, wkv, wo, bo, fw1, fb1, fw2, fb2,
      w_out, b_out)
    return out


# ----------------------------- pure-JAX reference -----------------------------

def _reference(x, params, *, num_heads, head_features):
    B, C, T = x.shape
    scale = head_features ** -0.5
    G = 32
    cg = C // G
    xg = x.reshape(B, G, cg * T)
    mean = xg.mean(axis=-1, keepdims=True)
    var = ((xg - mean) ** 2).mean(axis=-1, keepdims=True)
    xn = ((xg - mean) / jnp.sqrt(var + 1e-6)).reshape(B, C, T)
    h = xn * params["gn_g"][None, :, None] + params["gn_b"][None, :, None]
    h = jnp.einsum("bct,oc->bot", h, params["conv_in_w"]) + params["conv_in_b"][None, :, None]
    h = jnp.transpose(h, (0, 2, 1))                            # (B, T, C)

    def ln(z, g, b, eps=1e-5):
        m = z.mean(-1, keepdims=True)
        v = ((z - m) ** 2).mean(-1, keepdims=True)
        return (z - m) / jnp.sqrt(v + eps) * g + b

    for blk in params["blocks"]:
        xn_ = ln(h, blk["ln_g"], blk["ln_b"])
        cn_ = ln(h, blk["lnc_g"], blk["lnc_b"])
        q = xn_ @ blk["wq"].T
        kv = cn_ @ blk["wkv"].T
        mid = q.shape[-1]
        k_, v_ = kv[..., :mid], kv[..., mid:]
        D = mid // num_heads

        def sh(t):
            return t.reshape(B, T, num_heads, D).transpose(0, 2, 1, 3)

        qh, kh, vh = sh(q), sh(k_), sh(v_)
        sim = jnp.einsum("bhnd,bhmd->bhnm", qh, kh) * scale
        attn = jax.nn.softmax(sim, axis=-1)
        o = jnp.einsum("bhnm,bhmd->bhnd", attn, vh)
        o = o.transpose(0, 2, 1, 3).reshape(B, T, mid)
        o = o @ blk["wo"].T + blk["bo"]
        h = o + h
        ffh = jax.nn.gelu(h @ blk["ff_w1"].T + blk["ff_b1"], approximate=True)
        ffh = ffh @ blk["ff_w2"].T + blk["ff_b2"]
        h = ffh + h

    out = jnp.einsum("btc,oc->bto", h, params["conv_out_w"]) + params["conv_out_b"]
    return out.transpose(0, 2, 1)


if __name__ == "__main__":
    # Transformer1d(num_layers=2, channels=32, num_heads=2, head_features=16, multiplier=2)
    B, C, T = 2, 32, 16
    num_layers, num_heads, head_features, multiplier = 2, 2, 16, 2
    mid = num_heads * head_features          # 32
    mid_ff = C * multiplier                  # 64

    keys = iter(jax.random.split(jax.random.PRNGKey(0), 128))

    def rnd(shape, s=0.05):
        return jax.random.normal(next(keys), shape, jnp.float32) * s

    params = {
        "gn_g": 1.0 + rnd((C,)),
        "gn_b": rnd((C,)),
        "conv_in_w": rnd((C, C), 0.1),
        "conv_in_b": rnd((C,)),
        "conv_out_w": rnd((C, C), 0.1),
        "conv_out_b": rnd((C,)),
        "blocks": [],
    }
    for _ in range(num_layers):
        params["blocks"].append({
            "ln_g": 1.0 + rnd((C,)),
            "ln_b": rnd((C,)),
            "lnc_g": 1.0 + rnd((C,)),
            "lnc_b": rnd((C,)),
            "wq": rnd((mid, C), 0.1),
            "wkv": rnd((2 * mid, C), 0.1),
            "wo": rnd((C, mid), 0.1),
            "bo": rnd((C,)),
            "ff_w1": rnd((mid_ff, C), 0.1),
            "ff_b1": rnd((mid_ff,)),
            "ff_w2": rnd((C, mid_ff), 0.1),
            "ff_b2": rnd((C,)),
        })

    x = jax.random.normal(next(keys), (B, C, T), jnp.float32)

    out = transformer1d_forward(x, params, num_heads=num_heads, head_features=head_features)
    out = jax.block_until_ready(out)

    ref = _reference(x, params, num_heads=num_heads, head_features=head_features)
    assert out.shape == (B, C, T)
    err = float(jnp.max(jnp.abs(out - ref)))
    assert jnp.allclose(out, ref, atol=2e-4, rtol=2e-4), f"max abs err {err}"

    print("KERNEL_OK")
</pallas_src>

<mosaic_0001>
module attributes {stable_mosaic.version = 11 : i64} {
  func.func @_transformer1d_kernel(%arg0: i32, %arg1: memref<1x32x16xf32, #tpu.memory_space<vmem>>, %arg2: memref<32x1xf32, #tpu.memory_space<vmem>>, %arg3: memref<32x1xf32, #tpu.memory_space<vmem>>, %arg4: memref<32x32xf32, #tpu.memory_space<vmem>>, %arg5: memref<1x32xf32, #tpu.memory_space<vmem>>, %arg6: memref<2x1x32xf32, #tpu.memory_space<vmem>>, %arg7: memref<2x1x32xf32, #tpu.memory_space<vmem>>, %arg8: memref<2x1x32xf32, #tpu.memory_space<vmem>>, %arg9: memref<2x1x32xf32, #tpu.memory_space<vmem>>, %arg10: memref<2x32x32xf32, #tpu.memory_space<vmem>>, %arg11: memref<2x64x32xf32, #tpu.memory_space<vmem>>, %arg12: memref<2x32x32xf32, #tpu.memory_space<vmem>>, %arg13: memref<2x1x32xf32, #tpu.memory_space<vmem>>, %arg14: memref<2x64x32xf32, #tpu.memory_space<vmem>>, %arg15: memref<2x1x64xf32, #tpu.memory_space<vmem>>, %arg16: memref<2x32x64xf32, #tpu.memory_space<vmem>>, %arg17: memref<2x1x32xf32, #tpu.memory_space<vmem>>, %arg18: memref<32x32xf32, #tpu.memory_space<vmem>>, %arg19: memref<32x1xf32, #tpu.memory_space<vmem>>, %arg20: memref<1x32x16xf32, #tpu.memory_space<vmem>>) attributes {dimension_semantics = [#tpu.dimension_semantics<parallel>], iteration_bounds = array<i64: 2>, scalar_prefetch = 0 : i64, scratch_operands = 0 : i64, tpu.core_type = #tpu.core_type<tc>, window_params = [{transform_indices = @transform_0, window_bounds = array<i64: 1, 32, 16>}, {pipeline_mode = #tpu.pipeline_mode<synchronous>, transform_indices = @transform_1, window_bounds = array<i64: 32, 1>}, {pipeline_mode = #tpu.pipeline_mode<synchronous>, transform_indices = @transform_2, window_bounds = array<i64: 32, 1>}, {pipeline_mode = #tpu.pipeline_mode<synchronous>, transform_indices = @transform_3, window_bounds = array<i64: 32, 32>}, {pipeline_mode = #tpu.pipeline_mode<synchronous>, transform_indices = @transform_4, window_bounds = array<i64: 1, 32>}, {pipeline_mode = #tpu.pipeline_mode<synchronous>, transform_indices = @transform_5, window_bounds = array<i64: 2, 1, 32>}, {pipeline_mode = #tpu.pipeline_mode<synchronous>, transform_indices = @transform_6, window_bounds = array<i64: 2, 1, 32>}, {pipeline_mode = #tpu.pipeline_mode<synchronous>, transform_indices = @transform_7, window_bounds = array<i64: 2, 1, 32>}, {pipeline_mode = #tpu.pipeline_mode<synchronous>, transform_indices = @transform_8, window_bounds = array<i64: 2, 1, 32>}, {pipeline_mode = #tpu.pipeline_mode<synchronous>, transform_indices = @transform_9, window_bounds = array<i64: 2, 32, 32>}, {pipeline_mode = #tpu.pipeline_mode<synchronous>, transform_indices = @transform_10, window_bounds = array<i64: 2, 64, 32>}, {pipeline_mode = #tpu.pipeline_mode<synchronous>, transform_indices = @transform_11, window_bounds = array<i64: 2, 32, 32>}, {pipeline_mode = #tpu.pipeline_mode<synchronous>, transform_indices = @transform_12, window_bounds = array<i64: 2, 1, 32>}, {pipeline_mode = #tpu.pipeline_mode<synchronous>, transform_indices = @transform_13, window_bounds = array<i64: 2, 64, 32>}, {pipeline_mode = #tpu.pipeline_mode<synchronous>, transform_indices = @transform_14, window_bounds = array<i64: 2, 1, 64>}, {pipeline_mode = #tpu.pipeline_mode<synchronous>, transform_indices = @transform_15, window_bounds = array<i64: 2, 32, 64>}, {pipeline_mode = #tpu.pipeline_mode<synchronous>, transform_indices = @transform_16, window_bounds = array<i64: 2, 1, 32>}, {pipeline_mode = #tpu.pipeline_mode<synchronous>, transform_indices = @transform_17, window_bounds = array<i64: 32, 32>}, {pipeline_mode = #tpu.pipeline_mode<synchronous>, transform_indices = @transform_18, window_bounds = array<i64: 32, 1>}, {transform_indices = @transform_19, window_bounds = array<i64: 1, 32, 16>}]} {
    %c0 = arith.constant 0 : index
    %c0_0 = arith.constant 0 : index
    %c0_1 = arith.constant 0 : index
    %0 = vector.load %arg1[%c0, %c0_0, %c0_1] : memref<1x32x16xf32, #tpu.memory_space<vmem>>, vector<1x32x16xf32>
    %1 = vector.shape_cast %0 : vector<1x32x16xf32> to vector<32x16xf32>
    %cst = arith.constant dense<0.000000e+00> : vector<32xf32>
    %2 = vector.multi_reduction <add>, %1, %cst [1] : vector<32x16xf32> to vector<32xf32>
    %3 = vector.shape_cast %2 : vector<32xf32> to vector<32x1xf32>
    %cst_2 = arith.constant 1.600000e+01 : f32
    %4 = vector.broadcast %cst_2 : f32 to vector<32x1xf32>
    %5 = arith.divf %3, %4 : vector<32x1xf32>
    %6 = vector.broadcast %5 : vector<32x1xf32> to vector<32x16xf32>
    %7 = arith.subf %1, %6 : vector<32x16xf32>
    %8 = arith.mulf %7, %7 : vector<32x16xf32>
    %cst_3 = arith.constant dense<0.000000e+00> : vector<32xf32>
    %9 = vector.multi_reduction <add>, %8, %cst_3 [1] : vector<32x16xf32> to vector<32xf32>
    %10 = vector.shape_cast %9 : vector<32xf32> to vector<32x1xf32>
    %cst_4 = arith.constant 1.600000e+01 : f32
    %11 = vector.broadcast %cst_4 : f32 to vector<32x1xf32>
    %12 = arith.divf %10, %11 : vector<32x1xf32>
    %cst_5 = arith.constant 9.99999997E-7 : f32
    %13 = vector.broadcast %cst_5 : f32 to vector<32x1xf32>
    %14 = arith.addf %12, %13 : vector<32x1xf32>
    %15 = math.rsqrt %14 : vector<32x1xf32>
    %16 = vector.broadcast %15 : vector<32x1xf32> to vector<32x16xf32>
    %17 = arith.mulf %7, %16 : vector<32x16xf32>
    %c0_6 = arith.constant 0 : index
    %c0_7 = arith.constant 0 : index
    %18 = vector.load %arg2[%c0_6, %c0_7] : memref<32x1xf32, #tpu.memory_space<vmem>>, vector<32x1xf32>
    %19 = vector.broadcast %18 : vector<32x1xf32> to vector<32x16xf32>
    %20 = arith.mulf %17, %19 : vector<32x16xf32>
    %c0_8 = arith.constant 0 : index
    %c0_9 = arith.constant 0 : index
    %21 = vector.load %arg3[%c0_8, %c0_9] : memref<32x1xf32, #tpu.memory_space<vmem>>, vector<32x1xf32>
    %22 = vector.broadcast %21 : vector<32x1xf32> to vector<32x16xf32>
    %23 = arith.addf %20, %22 : vector<32x16xf32>
    %c0_10 = arith.constant 0 : index
    %c0_11 = arith.constant 0 : index
    %24 = vector.load %arg4[%c0_10, %c0_11] : memref<32x32xf32, #tpu.memory_space<vmem>>, vector<32x32xf32>
    %cst_12 = arith.constant dense<0.000000e+00> : vector<16x32xf32>
    %25 = tpu.matmul %23, %24, %cst_12 {dimension_numbers = #tpu.dot_dimension_numbers<[0], [1], [1], [0], [0, 1, 1, 0], [], []>} : vector<32x16xf32>, vector<32x32xf32>, vector<16x32xf32> -> vector<16x32xf32>
    %c0_13 = arith.constant 0 : index
    %c0_14 = arith.constant 0 : index
    %26 = vector.load %arg5[%c0_13, %c0_14] : memref<1x32xf32, #tpu.memory_space<vmem>>, vector<1x32xf32>
    %27 = vector.broadcast %26 : vector<1x32xf32> to vector<16x32xf32>
    %28 = arith.addf %25, %27 : vector<16x32xf32>
    %c0_15 = arith.constant 0 : index
    %c0_16 = arith.constant 0 : index
    %c0_17 = arith.constant 0 : index
    %29 = vector.load %arg6[%c0_15, %c0_16, %c0_17] : memref<2x1x32xf32, #tpu.memory_space<vmem>>, vector<1x1x32xf32>
    %30 = vector.shape_cast %29 : vector<1x1x32xf32> to vector<1x32xf32>
    %c0_18 = arith.constant 0 : index
    %c0_19 = arith.constant 0 : index
    %c0_20 = arith.constant 0 : index
    %31 = vector.load %arg7[%c0_18, %c0_19, %c0_20] : memref<2x1x32xf32, #tpu.memory_space<vmem>>, vector<1x1x32xf32>
    %32 = vector.shape_cast %31 : vector<1x1x32xf32> to vector<1x32xf32>
    %cst_21 = arith.constant dense<0.000000e+00> : vector<16xf32>
    %33 = vector.multi_reduction <add>, %28, %cst_21 [1] : vector<16x32xf32> to vector<16xf32>
    %34 = vector.shape_cast %33 : vector<16xf32> to vector<16x1xf32>
    %cst_22 = arith.constant 3.200000e+01 : f32
    %35 = vector.broadcast %cst_22 : f32 to vector<16x1xf32>
    %36 = arith.divf %34, %35 : vector<16x1xf32>
    %37 = vector.broadcast %36 : vector<16x1xf32> to vector<16x32xf32>
    %38 = arith.subf %28, %37 : vector<16x32xf32>
    %39 = arith.mulf %38, %38 : vector<16x32xf32>
    %cst_23 = arith.constant dense<0.000000e+00> : vector<16xf32>
    %40 = vector.multi_reduction <add>, %39, %cst_23 [1] : vector<16x32xf32> to vector<16xf32>
    %41 = vector.shape_cast %40 : vector<16xf32> to vector<16x1xf32>
    %cst_24 = arith.constant 3.200000e+01 : f32
    %42 = vector.broadcast %cst_24 : f32 to vector<16x1xf32>
    %43 = arith.divf %41, %42 : vector<16x1xf32>
    %cst_25 = arith.constant 9.99999974E-6 : f32
    %44 = vector.broadcast %cst_25 : f32 to vector<16x1xf32>
    %45 = arith.addf %43, %44 : vector<16x1xf32>
    %46 = math.rsqrt %45 : vector<16x1xf32>
    %47 = vector.broadcast %46 : vector<16x1xf32> to vector<16x32xf32>
    %48 = arith.mulf %38, %47 : vector<16x32xf32>
    %49 = vector.broadcast %30 : vector<1x32xf32> to vector<16x32xf32>
    %50 = arith.mulf %48, %49 : vector<16x32xf32>
    %51 = vector.broadcast %32 : vector<1x32xf32> to vector<16x32xf32>
    %52 = arith.addf %50, %51 : vector<16x32xf32>
    %c0_26 = arith.constant 0 : index
    %c0_27 = arith.constant 0 : index
    %c0_28 = arith.constant 0 : index
    %53 = vector.load %arg8[%c0_26, %c0_27, %c0_28] : memref<2x1x32xf32, #tpu.memory_space<vmem>>, vector<1x1x32xf32>
    %54 = vector.shape_cast %53 : vector<1x1x32xf32> to vector<1x32xf32>
    %c0_29 = arith.constant 0 : index
    %c0_30 = arith.constant 0 : index
    %c0_31 = arith.constant 0 : index
    %55 = vector.load %arg9[%c0_29, %c0_30, %c0_31] : memref<2x1x32xf32, #tpu.memory_space<vmem>>, vector<1x1x32xf32>
    %56 = vector.shape_cast %55 : vector<1x1x32xf32> to vector<1x32xf32>
    %cst_32 = arith.constant dense<0.000000e+00> : vector<16xf32>
    %57 = vector.multi_reduction <add>, %28, %cst_32 [1] : vector<16x32xf32> to vector<16xf32>
    %58 = vector.shape_cast %57 : vector<16xf32> to vector<16x1xf32>
    %cst_33 = arith.constant 3.200000e+01 : f32
    %59 = vector.broadcast %cst_33 : f32 to vector<16x1xf32>
    %60 = arith.divf %58, %59 : vector<16x1xf32>
    %61 = vector.broadcast %60 : vector<16x1xf32> to vector<16x32xf32>
    %62 = arith.subf %28, %61 : vector<16x32xf32>
    %63 = arith.mulf %62, %62 : vector<16x32xf32>
    %cst_34 = arith.constant dense<0.000000e+00> : vector<16xf32>
    %64 = vector.multi_reduction <add>, %63, %cst_34 [1] : vector<16x32xf32> to vector<16xf32>
    %65 = vector.shape_cast %64 : vector<16xf32> to vector<16x1xf32>
    %cst_35 = arith.constant 3.200000e+01 : f32
    %66 = vector.broadcast %cst_35 : f32 to vector<16x1xf32>
    %67 = arith.divf %65, %66 : vector<16x1xf32>
    %cst_36 = arith.constant 9.99999974E-6 : f32
    %68 = vector.broadcast %cst_36 : f32 to vector<16x1xf32>
    %69 = arith.addf %67, %68 : vector<16x1xf32>
    %70 = math.rsqrt %69 : vector<16x1xf32>
    %71 = vector.broadcast %70 : vector<16x1xf32> to vector<16x32xf32>
    %72 = arith.mulf %62, %71 : vector<16x32xf32>
    %73 = vector.broadcast %54 : vector<1x32xf32> to vector<16x32xf32>
    %74 = arith.mulf %72, %73 : vector<16x32xf32>
    %75 = vector.broadcast %56 : vector<1x32xf32> to vector<16x32xf32>
    %76 = arith.addf %74, %75 : vector<16x32xf32>
    %c0_37 = arith.constant 0 : index
    %c0_38 = arith.constant 0 : index
    %c0_39 = arith.constant 0 : index
    %77 = vector.load %arg10[%c0_37, %c0_38, %c0_39] : memref<2x32x32xf32, #tpu.memory_space<vmem>>, vector<1x32x32xf32>
    %78 = vector.shape_cast %77 : vector<1x32x32xf32> to vector<32x32xf32>
    %cst_40 = arith.constant dense<0.000000e+00> : vector<16x32xf32>
    %79 = tpu.matmul %52, %78, %cst_40 {dimension_numbers = #tpu.dot_dimension_numbers<[1], [1], [0], [0], [0, 0, 1, 0], [], []>} : vector<16x32xf32>, vector<32x32xf32>, vector<16x32xf32> -> vector<16x32xf32>
    %cst_41 = arith.constant 2.500000e-01 : f32
    %80 = vector.broadcast %cst_41 : f32 to vector<16x32xf32>
    %81 = arith.mulf %79, %80 : vector<16x32xf32>
    %c0_42 = arith.constant 0 : index
    %c0_43 = arith.constant 0 : index
    %c0_44 = arith.constant 0 : index
    %82 = vector.load %arg11[%c0_42, %c0_43, %c0_44] : memref<2x64x32xf32, #tpu.memory_space<vmem>>, vector<1x64x32xf32>
    %83 = vector.shape_cast %82 : vector<1x64x32xf32> to vector<64x32xf32>
    %cst_45 = arith.constant dense<0.000000e+00> : vector<16x64xf32>
    %84 = tpu.matmul %76, %83, %cst_45 {dimension_numbers = #tpu.dot_dimension_numbers<[1], [1], [0], [0], [0, 0, 1, 0], [], []>} : vector<16x32xf32>, vector<64x32xf32>, vector<16x64xf32> -> vector<16x64xf32>
    %85 = vector.extract_strided_slice %84 {offsets = [0, 0], sizes = [16, 32], strides = [1, 1]} : vector<16x64xf32> to vector<16x32xf32>
    %86 = vector.extract_strided_slice %84 {offsets = [0, 32], sizes = [16, 32], strides = [1, 1]} : vector<16x64xf32> to vector<16x32xf32>
    %c0_46 = arith.constant 0 : index
    %c0_47 = arith.constant 0 : index
    %c0_48 = arith.constant 0 : index
    %87 = vector.load %arg12[%c0_46, %c0_47, %c0_48] : memref<2x32x32xf32, #tpu.memory_space<vmem>>, vector<1x32x32xf32>
    %88 = vector.shape_cast %87 : vector<1x32x32xf32> to vector<32x32xf32>
    %c0_49 = arith.constant 0 : index
    %c0_50 = arith.constant 0 : index
    %c0_51 = arith.constant 0 : index
    %89 = vector.load %arg13[%c0_49, %c0_50, %c0_51] : memref<2x1x32xf32, #tpu.memory_space<vmem>>, vector<1x1x32xf32>
    %90 = vector.shape_cast %89 : vector<1x1x32xf32> to vector<1x32xf32>
    %91 = vector.broadcast %90 : vector<1x32xf32> to vector<16x32xf32>
    %92 = arith.addf %28, %91 : vector<16x32xf32>
    %93 = vector.extract_strided_slice %81 {offsets = [0, 0], sizes = [16, 16], strides = [1, 1]} : vector<16x32xf32> to vector<16x16xf32>
    %94 = vector.extract_strided_slice %85 {offsets = [0, 0], sizes = [16, 16], strides = [1, 1]} : vector<16x32xf32> to vector<16x16xf32>
    %95 = vector.extract_strided_slice %86 {offsets = [0, 0], sizes = [16, 16], strides = [1, 1]} : vector<16x32xf32> to vector<16x16xf32>
    %cst_52 = arith.constant dense<0.000000e+00> : vector<16x16xf32>
    %96 = tpu.matmul %93, %94, %cst_52 {dimension_numbers = #tpu.dot_dimension_numbers<[1], [1], [0], [0], [0, 0, 1, 0], [], []>} : vector<16x16xf32>, vector<16x16xf32>, vector<16x16xf32> -> vector<16x16xf32>
    %cst_53 = arith.constant dense<0xFF800000> : vector<16xf32>
    %97 = vector.multi_reduction <maximumf>, %96, %cst_53 [1] : vector<16x16xf32> to vector<16xf32>
    %98 = vector.shape_cast %97 : vector<16xf32> to vector<16x1xf32>
    %99 = vector.broadcast %98 : vector<16x1xf32> to vector<16x16xf32>
    %100 = arith.subf %96, %99 : vector<16x16xf32>
    %101 = math.exp %100 : vector<16x16xf32>
    %cst_54 = arith.constant dense<0.000000e+00> : vector<16xf32>
    %102 = vector.multi_reduction <add>, %101, %cst_54 [1] : vector<16x16xf32> to vector<16xf32>
    %103 = vector.shape_cast %102 : vector<16xf32> to vector<16x1xf32>
    %104 = vector.broadcast %103 : vector<16x1xf32> to vector<16x16xf32>
    %105 = arith.divf %101, %104 : vector<16x16xf32>
    %cst_55 = arith.constant dense<0.000000e+00> : vector<16x16xf32>
    %106 = tpu.matmul %105, %95, %cst_55 {dimension_numbers = #tpu.dot_dimension_numbers<[1], [0], [0], [1], [0, 0, 1, 1], [], []>} : vector<16x16xf32>, vector<16x16xf32>, vector<16x16xf32> -> vector<16x16xf32>
    %107 = vector.extract_strided_slice %88 {offsets = [0, 0], sizes = [32, 16], strides = [1, 1]} : vector<32x32xf32> to vector<32x16xf32>
    %cst_56 = arith.constant dense<0.000000e+00> : vector<16x32xf32>
    %108 = tpu.matmul %106, %107, %cst_56 {dimension_numbers = #tpu.dot_dimension_numbers<[1], [1], [0], [0], [0, 0, 1, 0], [], []>} : vector<16x16xf32>, vector<32x16xf32>, vector<16x32xf32> -> vector<16x32xf32>
    %109 = arith.addf %92, %108 : vector<16x32xf32>
    %110 = vector.extract_strided_slice %81 {offsets = [0, 16], sizes = [16, 16], strides = [1, 1]} : vector<16x32xf32> to vector<16x16xf32>
    %111 = vector.extract_strided_slice %85 {offsets = [0, 16], sizes = [16, 16], strides = [1, 1]} : vector<16x32xf32> to vector<16x16xf32>
    %112 = vector.extract_strided_slice %86 {offsets = [0, 16], sizes = [16, 16], strides = [1, 1]} : vector<16x32xf32> to vector<16x16xf32>
    %cst_57 = arith.constant dense<0.000000e+00> : vector<16x16xf32>
    %113 = tpu.matmul %110, %111, %cst_57 {dimension_numbers = #tpu.dot_dimension_numbers<[1], [1], [0], [0], [0, 0, 1, 0], [], []>} : vector<16x16xf32>, vector<16x16xf32>, vector<16x16xf32> -> vector<16x16xf32>
    %cst_58 = arith.constant dense<0xFF800000> : vector<16xf32>
    %114 = vector.multi_reduction <maximumf>, %113, %cst_58 [1] : vector<16x16xf32> to vector<16xf32>
    %115 = vector.shape_cast %114 : vector<16xf32> to vector<16x1xf32>
    %116 = vector.broadcast %115 : vector<16x1xf32> to vector<16x16xf32>
    %117 = arith.subf %113, %116 : vector<16x16xf32>
    %118 = math.exp %117 : vector<16x16xf32>
    %cst_59 = arith.constant dense<0.000000e+00> : vector<16xf32>
    %119 = vector.multi_reduction <add>, %118, %cst_59 [1] : vector<16x16xf32> to vector<16xf32>
    %120 = vector.shape_cast %119 : vector<16xf32> to vector<16x1xf32>
    %121 = vector.broadcast %120 : vector<16x1xf32> to vector<16x16xf32>
    %122 = arith.divf %118, %121 : vector<16x16xf32>
    %cst_60 = arith.constant dense<0.000000e+00> : vector<16x16xf32>
    %123 = tpu.matmul %122, %112, %cst_60 {dimension_numbers = #tpu.dot_dimension_numbers<[1], [0], [0], [1], [0, 0, 1, 1], [], []>} : vector<16x16xf32>, vector<16x16xf32>, vector<16x16xf32> -> vector<16x16xf32>
    %124 = vector.extract_strided_slice %88 {offsets = [0, 16], sizes = [32, 16], strides = [1, 1]} : vector<32x32xf32> to vector<32x16xf32>
    %cst_61 = arith.constant dense<0.000000e+00> : vector<16x32xf32>
    %125 = tpu.matmul %123, %124, %cst_61 {dimension_numbers = #tpu.dot_dimension_numbers<[1], [1], [0], [0], [0, 0, 1, 0], [], []>} : vector<16x16xf32>, vector<32x16xf32>, vector<16x32xf32> -> vector<16x32xf32>
    %126 = arith.addf %109, %125 : vector<16x32xf32>
    %c0_62 = arith.constant 0 : index
    %c0_63 = arith.constant 0 : index
    %c0_64 = arith.constant 0 : index
    %127 = vector.load %arg14[%c0_62, %c0_63, %c0_64] : memref<2x64x32xf32, #tpu.memory_space<vmem>>, vector<1x64x32xf32>
    %128 = vector.shape_cast %127 : vector<1x64x32xf32> to vector<64x32xf32>
    %cst_65 = arith.constant dense<0.000000e+00> : vector<16x64xf32>
    %129 = tpu.matmul %126, %128, %cst_65 {dimension_numbers = #tpu.dot_dimension_numbers<[1], [1], [0], [0], [0, 0, 1, 0], [], []>} : vector<16x32xf32>, vector<64x32xf32>, vector<16x64xf32> -> vector<16x64xf32>
    %c0_66 = arith.constant 0 : index
    %c0_67 = arith.constant 0 : index
    %c0_68 = arith.constant 0 : index
    %130 = vector.load %arg15[%c0_66, %c0_67, %c0_68] : memref<2x1x64xf32, #tpu.memory_space<vmem>>, vector<1x1x64xf32>
    %131 = vector.shape_cast %130 : vector<1x1x64xf32> to vector<1x64xf32>
    %132 = vector.broadcast %131 : vector<1x64xf32> to vector<16x64xf32>
    %133 = arith.addf %129, %132 : vector<16x64xf32>
    %134 = arith.mulf %133, %133 : vector<16x64xf32>
    %135 = arith.mulf %133, %134 : vector<16x64xf32>
    %cst_69 = arith.constant 4.471500e-02 : f32
    %136 = vector.broadcast %cst_69 : f32 to vector<16x64xf32>
    %137 = arith.mulf %136, %135 : vector<16x64xf32>
    %138 = arith.addf %133, %137 : vector<16x64xf32>
    %cst_70 = arith.constant 0.797884583 : f32
    %139 = vector.broadcast %cst_70 : f32 to vector<16x64xf32>
    %140 = arith.mulf %139, %138 : vector<16x64xf32>
    %141 = math.tanh %140 : vector<16x64xf32>
    %cst_71 = arith.constant 1.000000e+00 : f32
    %142 = vector.broadcast %cst_71 : f32 to vector<16x64xf32>
    %143 = arith.addf %142, %141 : vector<16x64xf32>
    %cst_72 = arith.constant 5.000000e-01 : f32
    %144 = vector.broadcast %cst_72 : f32 to vector<16x64xf32>
    %145 = arith.mulf %144, %143 : vector<16x64xf32>
    %146 = arith.mulf %133, %145 : vector<16x64xf32>
    %c0_73 = arith.constant 0 : index
    %c0_74 = arith.constant 0 : index
    %c0_75 = arith.constant 0 : index
    %147 = vector.load %arg16[%c0_73, %c0_74, %c0_75] : memref<2x32x64xf32, #tpu.memory_space<vmem>>, vector<1x32x64xf32>
    %148 = vector.shape_cast %147 : vector<1x32x64xf32> to vector<32x64xf32>
    %cst_76 = arith.constant dense<0.000000e+00> : vector<16x32xf32>
    %149 = tpu.matmul %146, %148, %cst_76 {dimension_numbers = #tpu.dot_dimension_numbers<[1], [1], [0], [0], [0, 0, 1, 0], [], []>} : vector<16x64xf32>, vector<32x64xf32>, vector<16x32xf32> -> vector<16x32xf32>
    %150 = arith.addf %126, %149 : vector<16x32xf32>
    %c0_77 = arith.constant 0 : index
    %c0_78 = arith.constant 0 : index
    %c0_79 = arith.constant 0 : index
    %151 = vector.load %arg17[%c0_77, %c0_78, %c0_79] : memref<2x1x32xf32, #tpu.memory_space<vmem>>, vector<1x1x32xf32>
    %152 = vector.shape_cast %151 : vector<1x1x32xf32> to vector<1x32xf32>
    %153 = vector.broadcast %152 : vector<1x32xf32> to vector<16x32xf32>
    %154 = arith.addf %150, %153 : vector<16x32xf32>
    %c1 = arith.constant 1 : index
    %c0_80 = arith.constant 0 : index
    %c0_81 = arith.constant 0 : index
    %155 = vector.load %arg6[%c1, %c0_80, %c0_81] : memref<2x1x32xf32, #tpu.memory_space<vmem>>, vector<1x1x32xf32>
    %156 = vector.shape_cast %155 : vector<1x1x32xf32> to vector<1x32xf32>
    %c1_82 = arith.constant 1 : index
    %c0_83 = arith.constant 0 : index
    %c0_84 = arith.constant 0 : index
    %157 = vector.load %arg7[%c1_82, %c0_83, %c0_84] : memref<2x1x32xf32, #tpu.memory_space<vmem>>, vector<1x1x32xf32>
    %158 = vector.shape_cast %157 : vector<1x1x32xf32> to vector<1x32xf32>
    %cst_85 = arith.constant dense<0.000000e+00> : vector<16xf32>
    %159 = vector.multi_reduction <add>, %154, %cst_85 [1] : vector<16x32xf32> to vector<16xf32>
    %160 = vector.shape_cast %159 : vector<16xf32> to vector<16x1xf32>
    %cst_86 = arith.constant 3.200000e+01 : f32
    %161 = vector.broadcast %cst_86 : f32 to vector<16x1xf32>
    %162 = arith.divf %160, %161 : vector<16x1xf32>
    %163 = vector.broadcast %162 : vector<16x1xf32> to vector<16x32xf32>
    %164 = arith.subf %154, %163 : vector<16x32xf32>
    %165 = arith.mulf %164, %164 : vector<16x32xf32>
    %cst_87 = arith.constant dense<0.000000e+00> : vector<16xf32>
    %166 = vector.multi_reduction <add>, %165, %cst_87 [1] : vector<16x32xf32> to vector<16xf32>
    %167 = vector.shape_cast %166 : vector<16xf32> to vector<16x1xf32>
    %cst_88 = arith.constant 3.200000e+01 : f32
    %168 = vector.broadcast %cst_88 : f32 to vector<16x1xf32>
    %169 = arith.divf %167, %168 : vector<16x1xf32>
    %cst_89 = arith.constant 9.99999974E-6 : f32
    %170 = vector.broadcast %cst_89 : f32 to vector<16x1xf32>
    %171 = arith.addf %169, %170 : vector<16x1xf32>
    %172 = math.rsqrt %171 : vector<16x1xf32>
    %173 = vector.broadcast %172 : vector<16x1xf32> to vector<16x32xf32>
    %174 = arith.mulf %164, %173 : vector<16x32xf32>
    %175 = vector.broadcast %156 : vector<1x32xf32> to vector<16x32xf32>
    %176 = arith.mulf %174, %175 : vector<16x32xf32>
    %177 = vector.broadcast %158 : vector<1x32xf32> to vector<16x32xf32>
    %178 = arith.addf %176, %177 : vector<16x32xf32>
    %c1_90 = arith.constant 1 : index
    %c0_91 = arith.constant 0 : index
    %c0_92 = arith.constant 0 : index
    %179 = vector.load %arg8[%c1_90, %c0_91, %c0_92] : memref<2x1x32xf32, #tpu.memory_space<vmem>>, vector<1x1x32xf32>
    %180 = vector.shape_cast %179 : vector<1x1x32xf32> to vector<1x32xf32>
    %c1_93 = arith.constant 1 : index
    %c0_94 = arith.constant 0 : index
    %c0_95 = arith.constant 0 : index
    %181 = vector.load %arg9[%c1_93, %c0_94, %c0_95] : memref<2x1x32xf32, #tpu.memory_space<vmem>>, vector<1x1x32xf32>
    %182 = vector.shape_cast %181 : vector<1x1x32xf32> to vector<1x32xf32>
    %cst_96 = arith.constant dense<0.000000e+00> : vector<16xf32>
    %183 = vector.multi_reduction <add>, %154, %cst_96 [1] : vector<16x32xf32> to vector<16xf32>
    %184 = vector.shape_cast %183 : vector<16xf32> to vector<16x1xf32>
    %cst_97 = arith.constant 3.200000e+01 : f32
    %185 = vector.broadcast %cst_97 : f32 to vector<16x1xf32>
    %186 = arith.divf %184, %185 : vector<16x1xf32>
    %187 = vector.broadcast %186 : vector<16x1xf32> to vector<16x32xf32>
    %188 = arith.subf %154, %187 : vector<16x32xf32>
    %189 = arith.mulf %188, %188 : vector<16x32xf32>
    %cst_98 = arith.constant dense<0.000000e+00> : vector<16xf32>
    %190 = vector.multi_reduction <add>, %189, %cst_98 [1] : vector<16x32xf32> to vector<16xf32>
    %191 = vector.shape_cast %190 : vector<16xf32> to vector<16x1xf32>
    %cst_99 = arith.constant 3.200000e+01 : f32
    %192 = vector.broadcast %cst_99 : f32 to vector<16x1xf32>
    %193 = arith.divf %191, %192 : vector<16x1xf32>
    %cst_100 = arith.constant 9.99999974E-6 : f32
    %194 = vector.broadcast %cst_100 : f32 to vector<16x1xf32>
    %195 = arith.addf %193, %194 : vector<16x1xf32>
    %196 = math.rsqrt %195 : vector<16x1xf32>
    %197 = vector.broadcast %196 : vector<16x1xf32> to vector<16x32xf32>
    %198 = arith.mulf %188, %197 : vector<16x32xf32>
    %199 = vector.broadcast %180 : vector<1x32xf32> to vector<16x32xf32>
    %200 = arith.mulf %198, %199 : vector<16x32xf32>
    %201 = vector.broadcast %182 : vector<1x32xf32> to vector<16x32xf32>
    %202 = arith.addf %200, %201 : vector<16x32xf32>
    %c1_101 = arith.constant 1 : index
    %c0_102 = arith.constant 0 : index
    %c0_103 = arith.constant 0 : index
    %203 = vector.load %arg10[%c1_101, %c0_102, %c0_103] : memref<2x32x32xf32, #tpu.memory_space<vmem>>, vector<1x32x32xf32>
    %204 = vector.shape_cast %203 : vector<1x32x32xf32> to vector<32x32xf32>
    %cst_104 = arith.constant dense<0.000000e+00> : vector<16x32xf32>
    %205 = tpu.matmul %178, %204, %cst_104 {dimension_numbers = #tpu.dot_dimension_numbers<[1], [1], [0], [0], [0, 0, 1, 0], [], []>} : vector<16x32xf32>, vector<32x32xf32>, vector<16x32xf32> -> vector<16x32xf32>
    %cst_105 = arith.constant 2.500000e-01 : f32
    %206 = vector.broadcast %cst_105 : f32 to vector<16x32xf32>
    %207 = arith.mulf %205, %206 : vector<16x32xf32>
    %c1_106 = arith.constant 1 : index
    %c0_107 = arith.constant 0 : index
    %c0_108 = arith.constant 0 : index
    %208 = vector.load %arg11[%c1_106, %c0_107, %c0_108] : memref<2x64x32xf32, #tpu.memory_space<vmem>>, vector<1x64x32xf32>
    %209 = vector.shape_cast %208 : vector<1x64x32xf32> to vector<64x32xf32>
    %cst_109 = arith.constant dense<0.000000e+00> : vector<16x64xf32>
    %210 = tpu.matmul %202, %209, %cst_109 {dimension_numbers = #tpu.dot_dimension_numbers<[1], [1], [0], [0], [0, 0, 1, 0], [], []>} : vector<16x32xf32>, vector<64x32xf32>, vector<16x64xf32> -> vector<16x64xf32>
    %211 = vector.extract_strided_slice %210 {offsets = [0, 0], sizes = [16, 32], strides = [1, 1]} : vector<16x64xf32> to vector<16x32xf32>
    %212 = vector.extract_strided_slice %210 {offsets = [0, 32], sizes = [16, 32], strides = [1, 1]} : vector<16x64xf32> to vector<16x32xf32>
    %c1_110 = arith.constant 1 : index
    %c0_111 = arith.constant 0 : index
    %c0_112 = arith.constant 0 : index
    %213 = vector.load %arg12[%c1_110, %c0_111, %c0_112] : memref<2x32x32xf32, #tpu.memory_space<vmem>>, vector<1x32x32xf32>
    %214 = vector.shape_cast %213 : vector<1x32x32xf32> to vector<32x32xf32>
    %c1_113 = arith.constant 1 : index
    %c0_114 = arith.constant 0 : index
    %c0_115 = arith.constant 0 : index
    %215 = vector.load %arg13[%c1_113, %c0_114, %c0_115] : memref<2x1x32xf32, #tpu.memory_space<vmem>>, vector<1x1x32xf32>
    %216 = vector.shape_cast %215 : vector<1x1x32xf32> to vector<1x32xf32>
    %217 = vector.broadcast %216 : vector<1x32xf32> to vector<16x32xf32>
    %218 = arith.addf %154, %217 : vector<16x32xf32>
    %219 = vector.extract_strided_slice %207 {offsets = [0, 0], sizes = [16, 16], strides = [1, 1]} : vector<16x32xf32> to vector<16x16xf32>
    %220 = vector.extract_strided_slice %211 {offsets = [0, 0], sizes = [16, 16], strides = [1, 1]} : vector<16x32xf32> to vector<16x16xf32>
    %221 = vector.extract_strided_slice %212 {offsets = [0, 0], sizes = [16, 16], strides = [1, 1]} : vector<16x32xf32> to vector<16x16xf32>
    %cst_116 = arith.constant dense<0.000000e+00> : vector<16x16xf32>
    %222 = tpu.matmul %219, %220, %cst_116 {dimension_numbers = #tpu.dot_dimension_numbers<[1], [1], [0], [0], [0, 0, 1, 0], [], []>} : vector<16x16xf32>, vector<16x16xf32>, vector<16x16xf32> -> vector<16x16xf32>
    %cst_117 = arith.constant dense<0xFF800000> : vector<16xf32>
    %223 = vector.multi_reduction <maximumf>, %222, %cst_117 [1] : vector<16x16xf32> to vector<16xf32>
    %224 = vector.shape_cast %223 : vector<16xf32> to vector<16x1xf32>
    %225 = vector.broadcast %224 : vector<16x1xf32> to vector<16x16xf32>
    %226 = arith.subf %222, %225 : vector<16x16xf32>
    %227 = math.exp %226 : vector<16x16xf32>
    %cst_118 = arith.constant dense<0.000000e+00> : vector<16xf32>
    %228 = vector.multi_reduction <add>, %227, %cst_118 [1] : vector<16x16xf32> to vector<16xf32>
    %229 = vector.shape_cast %228 : vector<16xf32> to vector<16x1xf32>
    %230 = vector.broadcast %229 : vector<16x1xf32> to vector<16x16xf32>
    %231 = arith.divf %227, %230 : vector<16x16xf32>
    %cst_119 = arith.constant dense<0.000000e+00> : vector<16x16xf32>
    %232 = tpu.matmul %231, %221, %cst_119 {dimension_numbers = #tpu.dot_dimension_numbers<[1], [0], [0], [1], [0, 0, 1, 1], [], []>} : vector<16x16xf32>, vector<16x16xf32>, vector<16x16xf32> -> vector<16x16xf32>
    %233 = vector.extract_strided_slice %214 {offsets = [0, 0], sizes = [32, 16], strides = [1, 1]} : vector<32x32xf32> to vector<32x16xf32>
    %cst_120 = arith.constant dense<0.000000e+00> : vector<16x32xf32>
    %234 = tpu.matmul %232, %233, %cst_120 {dimension_numbers = #tpu.dot_dimension_numbers<[1], [1], [0], [0], [0, 0, 1, 0], [], []>} : vector<16x16xf32>, vector<32x16xf32>, vector<16x32xf32> -> vector<16x32xf32>
    %235 = arith.addf %218, %234 : vector<16x32xf32>
    %236 = vector.extract_strided_slice %207 {offsets = [0, 16], sizes = [16, 16], strides = [1, 1]} : vector<16x32xf32> to vector<16x16xf32>
    %237 = vector.extract_strided_slice %211 {offsets = [0, 16], sizes = [16, 16], strides = [1, 1]} : vector<16x32xf32> to vector<16x16xf32>
    %238 = vector.extract_strided_slice %212 {offsets = [0, 16], sizes = [16, 16], strides = [1, 1]} : vector<16x32xf32> to vector<16x16xf32>
    %cst_121 = arith.constant dense<0.000000e+00> : vector<16x16xf32>
    %239 = tpu.matmul %236, %237, %cst_121 {dimension_numbers = #tpu.dot_dimension_numbers<[1], [1], [0], [0], [0, 0, 1, 0], [], []>} : vector<16x16xf32>, vector<16x16xf32>, vector<16x16xf32> -> vector<16x16xf32>
    %cst_122 = arith.constant dense<0xFF800000> : vector<16xf32>
    %240 = vector.multi_reduction <maximumf>, %239, %cst_122 [1] : vector<16x16xf32> to vector<16xf32>
    %241 = vector.shape_cast %240 : vector<16xf32> to vector<16x1xf32>
    %242 = vector.broadcast %241 : vector<16x1xf32> to vector<16x16xf32>
    %243 = arith.subf %239, %242 : vector<16x16xf32>
    %244 = math.exp %243 : vector<16x16xf32>
    %cst_123 = arith.constant dense<0.000000e+00> : vector<16xf32>
    %245 = vector.multi_reduction <add>, %244, %cst_123 [1] : vector<16x16xf32> to vector<16xf32>
    %246 = vector.shape_cast %245 : vector<16xf32> to vector<16x1xf32>
    %247 = vector.broadcast %246 : vector<16x1xf32> to vector<16x16xf32>
    %248 = arith.divf %244, %247 : vector<16x16xf32>
    %cst_124 = arith.constant dense<0.000000e+00> : vector<16x16xf32>
    %249 = tpu.matmul %248, %238, %cst_124 {dimension_numbers = #tpu.dot_dimension_numbers<[1], [0], [0], [1], [0, 0, 1, 1], [], []>} : vector<16x16xf32>, vector<16x16xf32>, vector<16x16xf32> -> vector<16x16xf32>
    %250 = vector.extract_strided_slice %214 {offsets = [0, 16], sizes = [32, 16], strides = [1, 1]} : vector<32x32xf32> to vector<32x16xf32>
    %cst_125 = arith.constant dense<0.000000e+00> : vector<16x32xf32>
    %251 = tpu.matmul %249, %250, %cst_125 {dimension_numbers = #tpu.dot_dimension_numbers<[1], [1], [0], [0], [0, 0, 1, 0], [], []>} : vector<16x16xf32>, vector<32x16xf32>, vector<16x32xf32> -> vector<16x32xf32>
    %252 = arith.addf %235, %251 : vector<16x32xf32>
    %c1_126 = arith.constant 1 : index
    %c0_127 = arith.constant 0 : index
    %c0_128 = arith.constant 0 : index
    %253 = vector.load %arg14[%c1_126, %c0_127, %c0_128] : memref<2x64x32xf32, #tpu.memory_space<vmem>>, vector<1x64x32xf32>
    %254 = vector.shape_cast %253 : vector<1x64x32xf32> to vector<64x32xf32>
    %cst_129 = arith.constant dense<0.000000e+00> : vector<16x64xf32>
    %255 = tpu.matmul %252, %254, %cst_129 {dimension_numbers = #tpu.dot_dimension_numbers<[1], [1], [0], [0], [0, 0, 1, 0], [], []>} : vector<16x32xf32>, vector<64x32xf32>, vector<16x64xf32> -> vector<16x64xf32>
    %c1_130 = arith.constant 1 : index
    %c0_131 = arith.constant 0 : index
    %c0_132 = arith.constant 0 : index
    %256 = vector.load %arg15[%c1_130, %c0_131, %c0_132] : memref<2x1x64xf32, #tpu.memory_space<vmem>>, vector<1x1x64xf32>
    %257 = vector.shape_cast %256 : vector<1x1x64xf32> to vector<1x64xf32>
    %258 = vector.broadcast %257 : vector<1x64xf32> to vector<16x64xf32>
    %259 = arith.addf %255, %258 : vector<16x64xf32>
    %260 = arith.mulf %259, %259 : vector<16x64xf32>
    %261 = arith.mulf %259, %260 : vector<16x64xf32>
    %cst_133 = arith.constant 4.471500e-02 : f32
    %262 = vector.broadcast %cst_133 : f32 to vector<16x64xf32>
    %263 = arith.mulf %262, %261 : vector<16x64xf32>
    %264 = arith.addf %259, %263 : vector<16x64xf32>
    %cst_134 = arith.constant 0.797884583 : f32
    %265 = vector.broadcast %cst_134 : f32 to vector<16x64xf32>
    %266 = arith.mulf %265, %264 : vector<16x64xf32>
    %267 = math.tanh %266 : vector<16x64xf32>
    %cst_135 = arith.constant 1.000000e+00 : f32
    %268 = vector.broadcast %cst_135 : f32 to vector<16x64xf32>
    %269 = arith.addf %268, %267 : vector<16x64xf32>
    %cst_136 = arith.constant 5.000000e-01 : f32
    %270 = vector.broadcast %cst_136 : f32 to vector<16x64xf32>
    %271 = arith.mulf %270, %269 : vector<16x64xf32>
    %272 = arith.mulf %259, %271 : vector<16x64xf32>
    %c1_137 = arith.constant 1 : index
    %c0_138 = arith.constant 0 : index
    %c0_139 = arith.constant 0 : index
    %273 = vector.load %arg16[%c1_137, %c0_138, %c0_139] : memref<2x32x64xf32, #tpu.memory_space<vmem>>, vector<1x32x64xf32>
    %274 = vector.shape_cast %273 : vector<1x32x64xf32> to vector<32x64xf32>
    %cst_140 = arith.constant dense<0.000000e+00> : vector<16x32xf32>
    %275 = tpu.matmul %272, %274, %cst_140 {dimension_numbers = #tpu.dot_dimension_numbers<[1], [1], [0], [0], [0, 0, 1, 0], [], []>} : vector<16x64xf32>, vector<32x64xf32>, vector<16x32xf32> -> vector<16x32xf32>
    %276 = arith.addf %252, %275 : vector<16x32xf32>
    %c1_141 = arith.constant 1 : index
    %c0_142 = arith.constant 0 : index
    %c0_143 = arith.constant 0 : index
    %277 = vector.load %arg17[%c1_141, %c0_142, %c0_143] : memref<2x1x32xf32, #tpu.memory_space<vmem>>, vector<1x1x32xf32>
    %278 = vector.shape_cast %277 : vector<1x1x32xf32> to vector<1x32xf32>
    %279 = vector.broadcast %278 : vector<1x32xf32> to vector<16x32xf32>
    %280 = arith.addf %276, %279 : vector<16x32xf32>
    %c0_144 = arith.constant 0 : index
    %c0_145 = arith.constant 0 : index
    %281 = vector.load %arg18[%c0_144, %c0_145] : memref<32x32xf32, #tpu.memory_space<vmem>>, vector<32x32xf32>
    %cst_146 = arith.constant dense<0.000000e+00> : vector<32x16xf32>
    %282 = tpu.matmul %281, %280, %cst_146 {dimension_numbers = #tpu.dot_dimension_numbers<[1], [1], [0], [0], [0, 0, 1, 0], [], []>} : vector<32x32xf32>, vector<16x32xf32>, vector<32x16xf32> -> vector<32x16xf32>
    %c0_147 = arith.constant 0 : index
    %c0_148 = arith.constant 0 : index
    %283 = vector.load %arg19[%c0_147, %c0_148] : memref<32x1xf32, #tpu.memory_space<vmem>>, vector<32x1xf32>
    %284 = vector.broadcast %283 : vector<32x1xf32> to vector<32x16xf32>
    %285 = arith.addf %282, %284 : vector<32x16xf32>
    %c0_149 = arith.constant 0 : index
    %c0_150 = arith.constant 0 : index
    %c0_151 = arith.constant 0 : index
    %286 = vector.load %arg20[%c0_149, %c0_150, %c0_151] : memref<1x32x16xf32, #tpu.memory_space<vmem>>, vector<1x32x16xf32>
    %287 = vector.shape_cast %286 : vector<1x32x16xf32> to vector<32x16xf32>
    %288 = vector.shape_cast %285 : vector<32x16xf32> to vector<1x32x16xf32>
    tpu.vector_store %arg20[%c0_149, %c0_150, %c0_151], %288 {strides = array<i32>} : memref<1x32x16xf32, #tpu.memory_space<vmem>>, vector<1x32x16xf32>,
    return
  }
  func.func @transform_0(%arg0: i32) -> (i32, i32, i32) {
    %c0_i32 = arith.constant 0 : i32
    %c0_i32_0 = arith.constant 0 : i32
    %c0_i32_1 = arith.constant 0 : i32
    return %arg0, %c0_i32, %c0_i32_0 : i32, i32, i32
  }
  func.func @transform_1(%arg0: i32) -> (i32, i32) {
    %c0_i32 = arith.constant 0 : i32
    %c0_i32_0 = arith.constant 0 : i32
    %c0_i32_1 = arith.constant 0 : i32
    return %c0_i32, %c0_i32_0 : i32, i32
  }
  func.func @transform_2(%arg0: i32) -> (i32, i32) {
    %c0_i32 = arith.constant 0 : i32
    %c0_i32_0 = arith.constant 0 : i32
    %c0_i32_1 = arith.constant 0 : i32
    return %c0_i32, %c0_i32_0 : i32, i32
  }
  func.func @transform_3(%arg0: i32) -> (i32, i32) {
    %c0_i32 = arith.constant 0 : i32
    %c0_i32_0 = arith.constant 0 : i32
    %c0_i32_1 = arith.constant 0 : i32
    return %c0_i32, %c0_i32_0 : i32, i32
  }
  func.func @transform_4(%arg0: i32) -> (i32, i32) {
    %c0_i32 = arith.constant 0 : i32
    %c0_i32_0 = arith.constant 0 : i32
    %c0_i32_1 = arith.constant 0 : i32
    return %c0_i32, %c0_i32_0 : i32, i32
  }
  func.func @transform_5(%arg0: i32) -> (i32, i32, i32) {
    %c0_i32 = arith.constant 0 : i32
    %c0_i32_0 = arith.constant 0 : i32
    %c0_i32_1 = arith.constant 0 : i32
    %c0_i32_2 = arith.constant 0 : i32
    return %c0_i32, %c0_i32_0, %c0_i32_1 : i32, i32, i32
  }
  func.func @transform_6(%arg0: i32) -> (i32, i32, i32) {
    %c0_i32 = arith.constant 0 : i32
    %c0_i32_0 = arith.constant 0 : i32
    %c0_i32_1 = arith.constant 0 : i32
    %c0_i32_2 = arith.constant 0 : i32
    return %c0_i32, %c0_i32_0, %c0_i32_1 : i32, i32, i32
  }
  func.func @transform_7(%arg0: i32) -> (i32, i32, i32) {
    %c0_i32 = arith.constant 0 : i32
    %c0_i32_0 = arith.constant 0 : i32
    %c0_i32_1 = arith.constant 0 : i32
    %c0_i32_2 = arith.constant 0 : i32
    return %c0_i32, %c0_i32_0, %c0_i32_1 : i32, i32, i32
  }
  func.func @transform_8(%arg0: i32) -> (i32, i32, i32) {
    %c0_i32 = arith.constant 0 : i32
    %c0_i32_0 = arith.constant 0 : i32
    %c0_i32_1 = arith.constant 0 : i32
    %c0_i32_2 = arith.constant 0 : i32
    return %c0_i32, %c0_i32_0, %c0_i32_1 : i32, i32, i32
  }
  func.func @transform_9(%arg0: i32) -> (i32, i32, i32) {
    %c0_i32 = arith.constant 0 : i32
    %c0_i32_0 = arith.constant 0 : i32
    %c0_i32_1 = arith.constant 0 : i32
    %c0_i32_2 = arith.constant 0 : i32
    return %c0_i32, %c0_i32_0, %c0_i32_1 : i32, i32, i32
  }
  func.func @transform_10(%arg0: i32) -> (i32, i32, i32) {
    %c0_i32 = arith.constant 0 : i32
    %c0_i32_0 = arith.constant 0 : i32
    %c0_i32_1 = arith.constant 0 : i32
    %c0_i32_2 = arith.constant 0 : i32
    return %c0_i32, %c0_i32_0, %c0_i32_1 : i32, i32, i32
  }
  func.func @transform_11(%arg0: i32) -> (i32, i32, i32) {
    %c0_i32 = arith.constant 0 : i32
    %c0_i32_0 = arith.constant 0 : i32
    %c0_i32_1 = arith.constant 0 : i32
    %c0_i32_2 = arith.constant 0 : i32
    return %c0_i32, %c0_i32_0, %c0_i32_1 : i32, i32, i32
  }
  func.func @transform_12(%arg0: i32) -> (i32, i32, i32) {
    %c0_i32 = arith.constant 0 : i32
    %c0_i32_0 = arith.constant 0 : i32
    %c0_i32_1 = arith.constant 0 : i32
    %c0_i32_2 = arith.constant 0 : i32
    return %c0_i32, %c0_i32_0, %c0_i32_1 : i32, i32, i32
  }
  func.func @transform_13(%arg0: i32) -> (i32, i32, i32) {
    %c0_i32 = arith.constant 0 : i32
    %c0_i32_0 = arith.constant 0 : i32
    %c0_i32_1 = arith.constant 0 : i32
    %c0_i32_2 = arith.constant 0 : i32
    return %c0_i32, %c0_i32_0, %c0_i32_1 : i32, i32, i32
  }
  func.func @transform_14(%arg0: i32) -> (i32, i32, i32) {
    %c0_i32 = arith.constant 0 : i32
    %c0_i32_0 = arith.constant 0 : i32
    %c0_i32_1 = arith.constant 0 : i32
    %c0_i32_2 = arith.constant 0 : i32
    return %c0_i32, %c0_i32_0, %c0_i32_1 : i32, i32, i32
  }
  func.func @transform_15(%arg0: i32) -> (i32, i32, i32) {
    %c0_i32 = arith.constant 0 : i32
    %c0_i32_0 = arith.constant 0 : i32
    %c0_i32_1 = arith.constant 0 : i32
    %c0_i32_2 = arith.constant 0 : i32
    return %c0_i32, %c0_i32_0, %c0_i32_1 : i32, i32, i32
  }
  func.func @transform_16(%arg0: i32) -> (i32, i32, i32) {
    %c0_i32 = arith.constant 0 : i32
    %c0_i32_0 = arith.constant 0 : i32
    %c0_i32_1 = arith.constant 0 : i32
    %c0_i32_2 = arith.constant 0 : i32
    return %c0_i32, %c0_i32_0, %c0_i32_1 : i32, i32, i32
  }
  func.func @transform_17(%arg0: i32) -> (i32, i32) {
    %c0_i32 = arith.constant 0 : i32
    %c0_i32_0 = arith.constant 0 : i32
    %c0_i32_1 = arith.constant 0 : i32
    return %c0_i32, %c0_i32_0 : i32, i32
  }
  func.func @transform_18(%arg0: i32) -> (i32, i32) {
    %c0_i32 = arith.constant 0 : i32
    %c0_i32_0 = arith.constant 0 : i32
    %c0_i32_1 = arith.constant 0 : i32
    return %c0_i32, %c0_i32_0 : i32, i32
  }
  func.func @transform_19(%arg0: i32) -> (i32, i32, i32) {
    %c0_i32 = arith.constant 0 : i32
    %c0_i32_0 = arith.constant 0 : i32
    %c0_i32_1 = arith.constant 0 : i32
    return %arg0, %c0_i32, %c0_i32_0 : i32, i32, i32
  }
}

</mosaic_0001>

<bundles_post_ra>
// kernel: tpu_custom_call.1
= control target key start
LH: loop header
LB: loop body
LE: loop exit
PB: predicated region body
PF: predicated region fallthrough
CT: control target
= control target key end

     0   :  { %s4979_s0 = inlined_call_operand.vmem [shape: f32[2,32,16], index: 0, kind: input, shape index: {}]   ;;  %s4980_s1 = inlined_call_operand.vmem [shape: f32[32,1], index: 1, kind: input, shape index: {}]   ;;  %s4981_s2 = inlined_call_operand.vmem [shape: f32[32,1], index: 2, kind: input, shape index: {}]   ;;  %s4982_s3 = inlined_call_operand.vmem [shape: f32[32,32], index: 3, kind: input, shape index: {}]   ;;  %s4983_s4 = inlined_call_operand.vmem [shape: f32[1,32], index: 4, kind: input, shape index: {}]   ;;  %s4984_s5 = inlined_call_operand.vmem [shape: f32[2,1,32], index: 5, kind: input, shape index: {}]   ;;  %s4985_s6 = inlined_call_operand.vmem [shape: f32[2,1,32], index: 6, kind: input, shape index: {}]   ;;  %s4986_s7 = inlined_call_operand.vmem [shape: f32[2,1,32], index: 7, kind: input, shape index: {}]   ;;  %s4987_s8 = inlined_call_operand.vmem [shape: f32[2,1,32], index: 8, kind: input, shape index: {}]   ;;  %s4988_s9 = inlined_call_operand.vmem [shape: f32[2,32,32], index: 9, kind: input, shape index: {}]   ;;  %s4989_s10 = inlined_call_operand.vmem [shape: f32[2,64,32], index: 10, kind: input, shape index: {}]   ;;  %s4990_s11 = inlined_call_operand.vmem [shape: f32[2,32,32], index: 11, kind: input, shape index: {}]   ;;  %s4991_s12 = inlined_call_operand.vmem [shape: f32[2,1,32], index: 12, kind: input, shape index: {}]   ;;  %s4992_s13 = inlined_call_operand.vmem [shape: f32[2,64,32], index: 13, kind: input, shape index: {}]   ;;  %s4993_s14 = inlined_call_operand.vmem [shape: f32[2,1,64], index: 14, kind: input, shape index: {}]   ;;  %s4994_s15 = inlined_call_operand.vmem [shape: f32[2,32,64], index: 15, kind: input, shape index: {}]   ;;  %s4995_s16 = inlined_call_operand.vmem [shape: f32[2,1,32], index: 16, kind: input, shape index: {}]   ;;  %s4996_s17 = inlined_call_operand.vmem [shape: f32[32,32], index: 17, kind: input, shape index: {}]   ;;  %s4997_s18 = inlined_call_operand.vmem [shape: f32[32,1], index: 18, kind: input, shape index: {}]   ;;  %s4998_s19 = inlined_call_operand.vmem [shape: f32[2,32,16], index: 19, kind: output, shape index: {}]  }
   0x1   :  { %5003 = sst [smem:[#allocation2_spill]] %s4979_s0  ;;  %s4355_s0 = smov 0  }
   0x2   :  { %5004 = sst [smem:[#allocation3_spill]] %s4980_s1 }
   0x3   :  { %5005 = sst [smem:[#allocation4_spill]] %s4981_s2 }
   0x4   :  { %5006 = sst [smem:[#allocation5_spill]] %s4982_s3 }
   0x5   :  { %5007 = sst [smem:[#allocation6_spill]] %s4983_s4 }
   0x6 LB: > { %s3304_s30 = sadd.s32 4294967295, %s4249_s0   ;;  %p3308_p0 = scmp.ge.s32.totalorder %s4249_s0, 1  ;;  %s4249_s0 = sphi %s4355_s0, %s29_s0  }
   0x7   : > { %p537_p1 = scmp.lt.s32.totalorder %s4249_s0, 3 }
   0x9   : > { %p538_p2 = pnand %p3308_p0, %p537_p1 }
   0xa   : > { %p593_p3 = scmp.lt.s32.totalorder (!%p538_p2), %s3304_s30, 1  ;;  %vm607_vm0 = vcmask (!%p538_p2), 130048   ;;  %s5008_s22 = sld [smem:[#allocation2_spill]] (!%p538_p2)  ;;  %v4251_v8 = vmov (!%p538_p2), 0   ;;  %vm760_vm1 = vcmask (!%p538_p2), 261120   ;;  %vm1874_vm4 = vcmask (!%p538_p2), 523264  }
   0xb   : > { %541 = sbr.rel (%p538_p2) target bundleno = 5783 (0x1697), region = 96  ;;  %4136 = vset.pattern.permute.xlu1 (!%p538_p2), %v4251_v8  ;;  %4135 = vset.pattern.permute.xlu0 (!%p538_p2), %v4251_v8  ;;  %s5009_s25 = sld [smem:[#allocation3_spill]] (!%p538_p2)  ;;  %vm4426_vm2 = vmpackc.low (!%p538_p2), %vm760_vm1, %vm760_vm1 }
   0xc   : > { %s5010_s27 = sld [smem:[#allocation4_spill]] (!%p538_p2)  ;;  %s5014_s4 = sld [smem:[#allocation6_spill]] (!%p538_p2)  ;;  %vm4539_vm3 = vmpackc.low (!%p538_p2), %vm607_vm0, %vm607_vm0 }
   0xd   : > { %s4253_s23 = smov (!%p538_p2), 112   ;;  %s4254_s1 = smov (!%p538_p2), 80   ;;  %vm4666_vm5 = vmpackc.low (!%p538_p2), %vm1874_vm4, %vm1874_vm4 }
  0x11   : > { %v662_v24 = vld [vmem:[%s5009_s25 + $0x8] sm:$0xff] (!%p538_p2)  ;;  %v661_v26 = vld [vmem:[%s5009_s25] sm:$0xff] (!%p538_p2)  ;;  %v663_v27 = vld [vmem:[%s5009_s25 + $0x10] sm:$0xff] (!%p538_p2) }
  0x12   : > { %s5021_s30 = smov (!%p593_p3, %s3304_s30), 1  ;;  %v689_v25 = vld [vmem:[%s5010_s27] sm:$0xff]  ;;  %v690_v28 = vld [vmem:[%s5010_s27 + $0x8] sm:$0xff]  ;;  %v664_v29 = vld [vmem:[%s5009_s25 + $0x18] sm:$0xff] }
  0x13   : > { %s5002_s20 = sshll.u32 %s5021_s30, 5  ;;  %v691_v30 = vld [vmem:[%s5010_s27 + $0x10] sm:$0xff]  ;;  %v692_v36 = vld [vmem:[%s5010_s27 + $0x18] sm:$0xff]  ;;  %s5019_s24 = sshll.u32 %s5021_s30, 5 }
  0x14   : > { %s597_s2 = scalar_lea.vmem %s5008_s22, %s5002_s20  ;;  %s5011_s22 = sld [smem:[#allocation5_spill]] }
  0x15   : > { %v603_v0 = vld [vmem:[%s597_s2] sm:$0xff]  ;;  %v605_v1 = vld [vmem:[%s597_s2 + $0x10] sm:$0xff]  ;;  %v604_v2 = vld [vmem:[%s597_s2 + $0x8] sm:$0xff]  ;;  %s602_s20 = scalar_lea.vmem %s4998_s19, %s5019_s24 }
  0x16   : > { %v608_v3 = vsel %vm607_vm0, %v603_v0, 0.0  ;;  %v614_v4 = vsel %vm607_vm0, %v605_v1, 0.0  ;;  %v606_v5 = vld [vmem:[%s597_s2 + $0x18] sm:$0xff]  ;;  %v611_v6 = vsel %vm607_vm0, %v604_v2, 0.0  ;;  %s4252_s2 = smov 96  }
  0x17   : > { %609 = vadd.xlane.f32.xlu0 %v608_v3  ;;  %615 = vadd.xlane.f32.xlu1 %v614_v4  ;;  %v617_v7 = vsel %vm607_vm0, %v606_v5, 0.0 }
  0x1a   : > { %v717_v37 = vld [vmem:[%s5011_s22] sm:$0xff]  ;;  %v718_v38 = vld [vmem:[%s5011_s22 + $0x8] sm:$0xff]  ;;  %v719_v39 = vld [vmem:[%s5011_s22 + $0x10] sm:$0xff] }
  0x1b   : > { %612 = vadd.xlane.f32.xlu0 %v611_v6  ;;  %618 = vadd.xlane.f32.xlu1 %v617_v7  ;;  %v3864_v40 = vpack.c.bf16 %v718_v38, %v717_v37  ;;  %v720_v42 = vld [vmem:[%s5011_s22 + $0x18] sm:$0xff]  ;;  %v1018_v38 = vld [vmem:[%s4989_s10 + $0x10] sm:$0xff] }
  0x1c   : > { %v3870_v43 = vpack.c.bf16 %v720_v42, %v719_v39  ;;  %v1019_v39 = vld [vmem:[%s4989_s10 + $0x18] sm:$0xff]  ;;  %v917_v42 = vld [vmem:[%s4988_s9] sm:$0xff] }
  0x1d   : > { %3866 = vmatprep.subr.msk.bf16.mxu0 %vm4426_vm2, %v3864_v40 }
  0x1e   : > { %3869 = vmatpush3.bf16.xpose.msk.msra.mxu0 %vm4426_vm2, %v3864_v40  ;;  %v3894_v40 = vpack.c.bf16 %v1019_v39, %v1018_v38 }
  0x1f   : > { %3872 = vmatprep.subr.msk.bf16.mxu0 %vm4426_vm2, %v3870_v43 }
  0x26   : > { %3875 = vmatpush3.bf16.xpose.msk.msra.mxu0 %vm4426_vm2, %v3870_v43  ;;  %v918_v43 = vld [vmem:[%s4988_s9 + $0x8] sm:$0xff] }
  0xa4   : > { %v610_v9 = vpop.xlane.xlu0 %609  ;;  %v616_v10 = vpop.xlane.xlu1 %615 }
  0xa5   : > { %v621_v11 = vmul.f32 0.0625, %v610_v9  ;;  %v623_v12 = vmul.f32 0.0625, %v616_v10 }
  0xa7   : > { %v4375_v13 = vsub.f32 %v603_v0, %v621_v11  ;;  %v4377_v14 = vsub.f32 %v605_v1, %v623_v12 }
  0xa8   : > { %v613_v15 = vpop.xlane.xlu0 %612  ;;  %v619_v31 = vpop.xlane.xlu1 %618 }
  0xa9   : > { %v622_v16 = vmul.f32 0.0625, %v613_v15  ;;  %v629_v17 = vmul.f32 %v4375_v13, %v4375_v13  ;;  %v631_v18 = vmul.f32 %v4377_v14, %v4377_v14  ;;  %v624_v32 = vmul.f32 0.0625, %v619_v31 }
  0xab   : > { %v4383_v19 = vsub.f32 %v604_v2, %v622_v16  ;;  %v633_v20 = vsel %vm607_vm0, %v629_v17, 0.0  ;;  %v639_v21 = vsel %vm607_vm0, %v631_v18, 0.0  ;;  %v628_v33 = vsub.f32 %v606_v5, %v624_v32  ;;  %v3313_v18 = vld [vmem:[%s5014_s4] ss:$0 sm:$0xff] }
  0xac   : > { %634 = vadd.xlane.f32.xlu0 %v633_v20 }
  0xad   : > { %v630_v22 = vmul.f32 %v4383_v19, %v4383_v19  ;;  %v632_v34 = vmul.f32 %v628_v33, %v628_v33 }
  0xaf   : > { %v636_v23 = vsel %vm607_vm0, %v630_v22, 0.0  ;;  %v642_v35 = vsel %vm607_vm0, %v632_v34, 0.0 }
  0xb0   : > { %640 = vadd.xlane.f32.xlu0 %v639_v21  ;;  %637 = vadd.xlane.f32.xlu1 %v636_v23 }
  0xc1   : > { %672 = vperm.xlu1 %4136, %v662_v24  }
  0xc5   : > { %695 = vperm.xlu1 %4136, %v689_v25   ;;  %v1016_v25 = vld [vmem:[%s4989_s10] sm:$0xff] }
  0xc6   : > { %667 = vperm.xlu0 %4135, %v661_v26   ;;  %v1017_v26 = vld [vmem:[%s4989_s10 + $0x8] sm:$0xff] }
  0xc9   : > { %677 = vperm.xlu1 %4136, %v663_v27   ;;  %v3888_v27 = vpack.c.bf16 %v1017_v26, %v1016_v25 }
  0xcb   : > { %3890 = vmatprep.subr.msk.bf16.mxu0 %vm4426_vm2, %v3888_v27 }
  0xcd   : > { %700 = vperm.xlu1 %4136, %v690_v28  }
  0xd1   : > { %682 = vperm.xlu1 %4136, %v664_v29  }
  0xd5   : > { %705 = vperm.xlu1 %4136, %v691_v30  }
  0xf9   : > { %643 = vadd.xlane.f32.xlu1 %v642_v35 }
 0x10a   : > { %710 = vperm.xlu1 %4136, %v692_v36  }
 0x139   : > { %v635_v44 = vpop.xlane.xlu0 %634 }
 0x13a   : > { %v645_v45 = vmul.f32 0.0625, %v635_v44  ;;  %v1020_v44 = vld [vmem:[%s4989_s10 + $0x20] sm:$0xff] }
 0x13c   : > { %v649_v46 = vadd.f32 1e-06, %v645_v45  ;;  %v3876_v45 = vpack.c.bf16 %v918_v43, %v917_v42  ;;  %v1130_v42 = vld [vmem:[%s4990_s11 + $0x8] sm:$0xff] }
 0x13d   : > { %v638_v47 = vpop.xlane.xlu1 %637  ;;  %v641_v48 = vpop.xlane.xlu0 %640 }
 0x13e   : > { %4187 = vrsqrt.f32 %v649_v46  ;;  %v646_v49 = vmul.f32 0.0625, %v638_v47  ;;  %v647_v50 = vmul.f32 0.0625, %v641_v48  ;;  %v1021_v46 = vld [vmem:[%s4989_s10 + $0x28] sm:$0xff]  ;;  %v919_v47 = vld [vmem:[%s4988_s9 + $0x10] sm:$0xff]  ;;  %v920_v48 = vld [vmem:[%s4988_s9 + $0x18] sm:$0xff]  ;;  %3878 = vmatprep.subr.msk.bf16.mxu1 %vm4426_vm2, %v3876_v45 }
 0x13f   : > { %3881 = vmatpush3.bf16.xpose.msk.msra.mxu1 %vm4426_vm2, %v3876_v45 }
 0x140   : > { %v650_v51 = vadd.f32 1e-06, %v646_v49  ;;  %v651_v52 = vadd.f32 1e-06, %v647_v50  ;;  %v3900_v49 = vpack.c.bf16 %v1021_v46, %v1020_v44  ;;  %v3882_v50 = vpack.c.bf16 %v920_v48, %v919_v47 }
 0x141   : > { %v673_v53 = vpop.permute.xlu1 %672 }
 0x142   : > { %4189 = vrsqrt.f32 %v650_v51  ;;  %v1022_v51 = vld [vmem:[%s4989_s10 + $0x30] sm:$0xff]  ;;  %3884 = vmatprep.subr.msk.bf16.mxu1 %vm4426_vm2, %v3882_v50 }
 0x143   : > { %4191 = vrsqrt.f32 %v651_v52  ;;  %v1023_v52 = vld [vmem:[%s4989_s10 + $0x38] sm:$0xff] }
 0x145   : > { %v696_v54 = vpop.permute.xlu1 %695  ;;  %v668_v56 = vpop.permute.xlu0 %667 }
 0x147   : > { %3887 = vmatpush3.bf16.xpose.msk.msra.mxu1 %vm4426_vm2, %v3882_v50 }
 0x148   : > { %v4188_v55 = vpop.eup %4187 }
 0x149   : > { %v678_v57 = vpop.permute.xlu1 %677  ;;  %v657_v58 = vmul.f32 %v4188_v55, %v4375_v13 }
 0x14b   : > { %v685_v59 = vmul.f32 %v668_v56, %v657_v58 }
 0x14c   : > { %v4190_v60 = vpop.eup %4189 }
 0x14d   : > { %v4192_v61 = vpop.eup %4191  ;;  %v658_v62 = vmul.f32 %v4190_v60, %v4383_v19  ;;  %v713_v63 = vadd.f32 %v696_v54, %v685_v59  ;;  %v701_v0 = vpop.permute.xlu1 %700 }
 0x14e   : > { %v659_v2 = vmul.f32 %v4192_v61, %v4377_v14  ;;  %v3320_v61 = vld [vmem:[%s4984_s5] ss:$0 sm:$0xff] }
 0x14f   : > { %v686_v1 = vmul.f32 %v673_v53, %v658_v62  ;;  %728 = vxpose.xlu1.b32.start [1/4] (short) (narrow) %v713_v63, 16  ;;  %v3906_v53 = vpack.c.bf16 %v1023_v52, %v1022_v51  ;;  %v3322_v62 = vld [vmem:[%s4986_s7] ss:$0 sm:$0xff]  ;;  %v1131_v51 = vld [vmem:[%s4990_s11 + $0x10] sm:$0xff]  ;;  %v1132_v52 = vld [vmem:[%s4990_s11 + $0x18] sm:$0xff] }
 0x150   : > { %v687_v5 = vmul.f32 %v678_v57, %v659_v2 }
 0x151   : > { %v714_v3 = vadd.f32 %v701_v0, %v686_v1  ;;  %v683_v4 = vpop.permute.xlu1 %682  ;;  %v3321_v0 = vld [vmem:[%s4985_s6] ss:$0 sm:$0xff] }
 0x152   : > { %v3323_v1 = vld [vmem:[%s4987_s8] ss:$0 sm:$0xff] }
 0x153   : > { %729 = vxpose.xlu1.b32.cont [2/4] (short) (narrow) %v714_v3, 16 }
 0x155   : > { %v706_v6 = vpop.permute.xlu1 %705 }
 0x156   : > { %v715_v7 = vadd.f32 %v706_v6, %v687_v5 }
 0x158   : > { %730 = vxpose.xlu1.b32.cont [3/4] (short) (narrow) %v715_v7, 16 }
 0x186   : > { %v644_v8 = vpop.xlane.xlu1 %643 }
 0x187   : > { %v648_v9 = vmul.f32 0.0625, %v644_v8 }
 0x189   : > { %v652_v10 = vadd.f32 1e-06, %v648_v9 }
 0x18a   : > { %v711_v15 = vpop.permute.xlu1 %710 }
 0x18b   : > { %4193 = vrsqrt.f32 %v652_v10 }
 0x195   : > { %v4194_v11 = vpop.eup %4193 }
 0x196   : > { %v660_v12 = vmul.f32 %v4194_v11, %v628_v33 }
 0x198   : > { %v688_v13 = vmul.f32 %v683_v4, %v660_v12 }
 0x19a   : > { %v716_v16 = vadd.f32 %v711_v15, %v688_v13 }
 0x19c   : > { %731 = vxpose.xlu1.b32.end [4/4] (short) (narrow) %v716_v16, 16 }
 0x210   : > { %v744_v17 = vpop.trf.xlu1 }
 0x211   : > { %3631 = vmatprep.mubr.msk.f32.mxu0 %vm760_vm1, %v744_v17  ;;  %v3469_v17 = vld [vmem:[%s4994_s15 + $0x20] sm:$0xff] }
 0x214   : > { %v745_v14 = vpop.trf.xlu1 }
 0x215   : > { %3632 = vmatmul.mubr.msk.f32.vlgmr.msra.gmra.mrb[0].mxu0 %vm760_vm1, %v745_v14 }
 0x216   : > { %3893 = vmatpush3.bf16.xpose.msk.msra.mxu0 %vm4426_vm2, %v3888_v27 }
 0x217   : > { %3896 = vmatprep.subr.msk.bf16.mxu0 %vm4426_vm2, %v3894_v40 }
 0x21e   : > { %3899 = vmatpush3.bf16.xpose.msk.msra.mxu0 %vm4426_vm2, %v3894_v40  ;;  %v1129_v40 = vld [vmem:[%s4990_s11] sm:$0xff] }
 0x21f   : > { %3902 = vmatprep.subr.msk.bf16.mxu0 %vm4426_vm2, %v3900_v49  ;;  %v3922_v47 = vpack.c.bf16 %v1130_v42, %v1129_v40 }
 0x226   : > { %3905 = vmatpush3.bf16.xpose.msk.msra.mxu0 %vm4426_vm2, %v3900_v49 }
 0x227   : > { %3908 = vmatprep.subr.msk.bf16.mxu0 %vm4426_vm2, %v3906_v53 }
 0x22e   : > { %3911 = vmatpush3.bf16.xpose.msk.msra.mxu0 %vm4426_vm2, %v3906_v53  ;;  %v3928_v53 = vpack.c.bf16 %v1132_v52, %v1131_v51 }
 0x2e8   : > { %v3633_v19 = vpop.f32.mrb[0].mxu0 }
 0x2e9   : > { %v845_v20 = vpop.f32.mrb[1].mxu0  ;;  %v4451_v22 = vadd.f32 %v3633_v19, %v3313_v18 }
 0x2ea   : > { %v4449_v21 = vadd.f32 %v3313_v18, %v845_v20 }
 0x2eb   : > { %v859_v24 = vsel %vm760_vm1, %v4451_v22, 0.0 }
 0x2ec   : > { %v856_v23 = vsel %vm760_vm1, %v4449_v21, 0.0 }
 0x2ed   : > { %857 = vadd.xlane.f32.xlu0 %v856_v23 }
 0x2f1   : > { %860 = vadd.xlane.f32.xlu0 %v859_v24 }
 0x37a   : > { %v858_v28 = vpop.xlane.xlu0 %857 }
 0x37b   : > { %v863_v29 = vmul.f32 0.03125, %v858_v28 }
 0x37d   : > { %v865_v30 = vsub.f32 %v4449_v21, %v863_v29 }
 0x37e   : > { %v861_v31 = vpop.xlane.xlu0 %860 }
 0x37f   : > { %v864_v32 = vmul.f32 0.03125, %v861_v31  ;;  %v867_v33 = vmul.f32 %v865_v30, %v865_v30 }
 0x381   : > { %v866_v34 = vsub.f32 %v4451_v22, %v864_v32  ;;  %v869_v35 = vsel %vm760_vm1, %v867_v33, 0.0 }
 0x382   : > { %870 = vadd.xlane.f32.xlu0 %v869_v35 }
 0x383   : > { %v868_v36 = vmul.f32 %v866_v34, %v866_v34 }
 0x385   : > { %v872_v37 = vsel %vm760_vm1, %v868_v36, 0.0 }
 0x386   : > { %873 = vadd.xlane.f32.xlu0 %v872_v37 }
 0x40f   : > { %v871_v54 = vpop.xlane.xlu0 %870 }
 0x410   : > { %v875_v55 = vmul.f32 0.03125, %v871_v54 }
 0x412   : > { %v877_v56 = vadd.f32 1e-05, %v875_v55 }
 0x413   : > { %v874_v57 = vpop.xlane.xlu0 %873 }
 0x414   : > { %4195 = vrsqrt.f32 %v877_v56  ;;  %v876_v58 = vmul.f32 0.03125, %v874_v57 }
 0x416   : > { %v878_v59 = vadd.f32 1e-05, %v876_v58 }
 0x418   : > { %4197 = vrsqrt.f32 %v878_v59 }
 0x41e   : > { %v4196_v60 = vpop.eup %4195 }
 0x41f   : > { %v881_v63 = vmul.f32 %v4196_v60, %v865_v30 }
 0x421   : > { %v889_v2 = vmul.f32 %v3320_v61, %v881_v63  ;;  %v907_v3 = vmul.f32 %v3322_v62, %v881_v63 }
 0x422   : > { %v4198_v4 = vpop.eup %4197 }
 0x423   : > { %v882_v5 = vmul.f32 %v4198_v4, %v866_v34  ;;  %v897_v6 = vadd.f32 %v3321_v0, %v889_v2  ;;  %v915_v7 = vadd.f32 %v3323_v1, %v907_v3 }
 0x425   : > { %v890_v8 = vmul.f32 %v3320_v61, %v882_v5  ;;  %v908_v9 = vmul.f32 %v3322_v62, %v882_v5  ;;  %3642 = vmatprep.mubr.msk.f32.mxu1 %vm760_vm1, %v897_v6  ;;  %3661 = vmatprep.mubr.msk.f32.mxu0 %vm760_vm1, %v915_v7 }
 0x427   : > { %v898_v10 = vadd.f32 %v3321_v0, %v890_v8  ;;  %v916_v11 = vadd.f32 %v3323_v1, %v908_v9 }
 0x429   : > { %3643 = vmatmul.mubr.msk.f32.vlgmr.msra.gmra.mrb[0].mxu1 %vm760_vm1, %v898_v10  ;;  %3662 = vmatmul.mubr.msk.f32.vlgmr.msra.gmra.mrb[2].mxu0 %vm760_vm1, %v916_v11 }
 0x4fc   : > { %v3644_v12 = vpop.f32.mrb[0].mxu1  ;;  %v3663_v13 = vpop.f32.mrb[2].mxu0 }
 0x4fd   : > { %v1005_v15 = vpop.f32.mrb[1].mxu1  ;;  %v1120_v16 = vpop.f32.mrb[3].mxu0  ;;  %v1015_v20 = vmul.f32 0.25, %v3644_v12  ;;  %v4152_v12 = vpack.i.bf16 %v1130_v42, %v1129_v40  ;;  %v1736_v42 = vld [vmem:[%s4992_s13 + $0x20] sm:$0xff] }
 0x4fe   : > { %v1014_v14 = vmul.f32 0.25, %v1005_v15  ;;  %v3912_v18 = vpack.c.bf16 %v3663_v13, %v1120_v16  ;;  %v4543_v19 = vpack.i.bf16 %v3663_v13, %v1120_v16  ;;  %v4157_v13 = vpack.i.bf16 %v1132_v52, %v1131_v51 }
 0x500   : > { %3914 = vmatprep.subr.msk.bf16.mxu1 %vm4539_vm3, %v3912_v18  ;;  %3668 = vmatprep.mubr.msk.f32.mxu1 %vm607_vm0, %v1014_v14 }
 0x501   : > { %3917 = vmatpush3.bf16.xpose.msk.msra.mxu1 %vm4539_vm3, %v3912_v18 }
 0x508   : > { %3669 = vmatmul.mubr.msk.f32.vlgmr.msra.gmra.mrb[2].mxu1 %vm607_vm0, %v1015_v20 }
 0x5db   : > { %v3670_v23 = vpop.f32.mrb[2].mxu1 }
 0x5dc   : > { %v1220_v24 = vpop.f32.mrb[3].mxu1  ;;  %v1232_v26 = vsel %vm607_vm0, %v3670_v23, -inf }
 0x5dd   : > { %v1229_v25 = vsel %vm607_vm0, %v1220_v24, -inf }
 0x5de   : > { %1230 = vmax.xlane.f32.xlu0 %v1229_v25 }
 0x5e2   : > { %1233 = vmax.xlane.f32.xlu0 %v1232_v26 }
 0x66b   : > { %v1231_v27 = vpop.xlane.xlu0 %1230 }
 0x66c   : > { %v1235_v28 = vsub.f32 %v1220_v24, %v1231_v27 }
 0x66e   : > { %v1237_v29 = vmul.f32 1.442695, %v1235_v28 }
 0x66f   : > { %v1234_v30 = vpop.xlane.xlu0 %1233 }
 0x670   : > { %4199 = vpow2.f32 %v1237_v29  ;;  %v1236_v31 = vsub.f32 %v3670_v23, %v1234_v30 }
 0x672   : > { %v1239_v32 = vmul.f32 1.442695, %v1236_v31 }
 0x674   : > { %4201 = vpow2.f32 %v1239_v32 }
 0x67a   : > { %v4200_v33 = vpop.eup %4199 }
 0x67b   : > { %v1241_v34 = vsel %vm607_vm0, %v4200_v33, 0.0 }
 0x67c   : > { %1242 = vadd.xlane.f32.xlu1 %v1241_v34 }
 0x67e   : > { %v4202_v35 = vpop.eup %4201 }
 0x67f   : > { %v1244_v36 = vsel %vm607_vm0, %v4202_v35, 0.0 }
 0x680   : > { %1245 = vadd.xlane.f32.xlu0 %v1244_v36  ;;  %v1733_v36 = vld [vmem:[%s4992_s13 + $0x8] sm:$0xff] }
 0x696   : > { %4138 = vrot.lane.b32.xlu0 %v4543_v19, %s4252_s2 }
 0x69a   : > { %4143 = vrot.lane.b32.xlu0 %v4543_v19, %s4253_s23 }
 0x69e   : > { %1433 = vrot.lane.b32.xlu0 %v1014_v14, %s4253_s23 }
 0x6a2   : > { %1435 = vrot.lane.b32.xlu0 %v1015_v20, %s4253_s23 }
 0x709   : > { %v1243_v37 = vpop.xlane.xlu1 %1242 }
 0x70a   : > { %4203 = vrcp.f32 %v1243_v37  ;;  %v1734_v37 = vld [vmem:[%s4992_s13 + $0x10] sm:$0xff] }
 0x70d   : > { %v1246_v38 = vpop.xlane.xlu0 %1245 }
 0x70e   : > { %4205 = vrcp.f32 %v1246_v38 }
 0x711   : > { %v4139_v39 = vpop.permute.xlu0 %4138 }
 0x712   : > { %v4141_v43 = vunpack.i.h.bf16 %v4139_v39  ;;  %v4140_v44 = vunpack.i.l.bf16 %v4139_v39  ;;  %v1735_v39 = vld [vmem:[%s4992_s13 + $0x18] sm:$0xff] }
 0x713   : > { %v3962_v40 = vpack.c.bf16 %v1735_v39, %v1734_v37 }
 0x714   : > { %v4204_v45 = vpop.eup %4203  ;;  %v3918_v46 = vpack.c.bf16 %v4141_v43, %v4140_v44  ;;  %v1737_v43 = vld [vmem:[%s4992_s13 + $0x28] sm:$0xff] }
 0x715   : > { %v1248_v48 = vmul.f32 %v4204_v45, %v4200_v33  ;;  %v4144_v54 = vpop.permute.xlu0 %4143  ;;  %v3968_v44 = vpack.c.bf16 %v1737_v43, %v1736_v42  ;;  %v1738_v45 = vld [vmem:[%s4992_s13 + $0x30] sm:$0xff] }
 0x716   : > { %3919 = vmatprep.subr.bf16.mxu1 %v3918_v46  ;;  %v4146_v55 = vunpack.i.h.bf16 %v4144_v54  ;;  %v4145_v56 = vunpack.i.l.bf16 %v4144_v54 }
 0x717   : > { %3921 = vmatpush3.bf16.msra.mxu1 %v3918_v46  ;;  %3675 = vmatprep.mubr.msk.f32.mxu1 %vm607_vm0, %v1248_v48  ;;  %v1739_v46 = vld [vmem:[%s4992_s13 + $0x38] sm:$0xff] }
 0x718   : > { %v4206_v49 = vpop.eup %4205  ;;  %3924 = vmatprep.subr.msk.bf16.mxu1 %vm4539_vm3, %v3922_v47  ;;  %v3934_v57 = vpack.c.bf16 %v4146_v55, %v4145_v56 }
 0x719   : > { %v1250_v50 = vmul.f32 %v4206_v49, %v4202_v35  ;;  %v1434_v60 = vpop.permute.xlu0 %1433  ;;  %v1732_v35 = vld [vmem:[%s4992_s13] sm:$0xff] }
 0x71a   : > { %v3956_v38 = vpack.c.bf16 %v1733_v36, %v1732_v35 }
 0x71b   : > { %3676 = vmatmul.mubr.msk.f32.vlgmr.msra.gmra.mrb[4].mxu1 %vm607_vm0, %v1250_v50  ;;  %v3340_v50 = vld [vmem:[%s4991_s12] ss:$0 sm:$0xff] }
 0x71c   : > { %3958 = vmatprep.subr.msk.bf16.mxu0 %vm4426_vm2, %v3956_v38  ;;  %v1140_v52 = vadd.f32 %v3340_v50, %v4449_v21 }
 0x71d   : > { %v1436_v61 = vpop.permute.xlu0 %1435  ;;  %3961 = vmatpush3.bf16.xpose.msk.msra.mxu0 %vm4426_vm2, %v3956_v38 }
 0x71e   : > { %3964 = vmatprep.subr.msk.bf16.mxu0 %vm4426_vm2, %v3962_v40 }
 0x720   : > { %3927 = vmatpush3.bf16.xpose.msk.msra.mxu1 %vm4539_vm3, %v3922_v47  ;;  %v3974_v47 = vpack.c.bf16 %v1739_v46, %v1738_v45 }
 0x721   : > { %3930 = vmatprep.subr.msk.bf16.mxu1 %vm4539_vm3, %v3928_v53 }
 0x725   : > { %3967 = vmatpush3.bf16.xpose.msk.msra.mxu0 %vm4426_vm2, %v3962_v40 }
 0x726   : > { %3970 = vmatprep.subr.msk.bf16.mxu0 %vm4426_vm2, %v3968_v44 }
 0x728   : > { %3933 = vmatpush3.bf16.xpose.msk.msra.mxu1 %vm4539_vm3, %v3928_v53  ;;  %v1141_v53 = vadd.f32 %v3340_v50, %v4451_v22  ;;  %v1872_v22 = vld [vmem:[%s4994_s15 + $0x10] sm:$0xff]  ;;  %v3391_v50 = vld [vmem:[%s4988_s9 + $0x20] sm:$0xff] }
 0x729   : > { %3936 = vmatprep.subr.msk.bf16.mxu1 %vm4539_vm3, %v3934_v57 }
 0x72d   : > { %3973 = vmatpush3.bf16.xpose.msk.msra.mxu0 %vm4426_vm2, %v3968_v44 }
 0x72e   : > { %3976 = vmatprep.subr.msk.bf16.mxu0 %vm4426_vm2, %v3974_v47 }
 0x735   : > { %3979 = vmatpush3.bf16.xpose.msk.msra.mxu0 %vm4426_vm2, %v3974_v47  ;;  %v3403_v47 = vld [vmem:[%s4989_s10 + $0x50] sm:$0xff] }
 0x7ee   : > { %v3677_v58 = vpop.f32.mrb[4].mxu1 }
 0x7ef   : > { %v1329_v59 = vpop.f32.mrb[5].mxu1 }
 0x7f0   : > { %3686 = vmatprep.mubr.msk.f32.mxu1 %vm607_vm0, %v1329_v59 }
 0x7f1   : > { %3687 = vmatmul.mubr.msk.f32.vlgmr.msra.gmra.mrb[6].mxu1 %vm607_vm0, %v3677_v58  ;;  %v1871_v58 = vld [vmem:[%s4994_s15 + $0x8] sm:$0xff] }
 0x7f2   : > { %3939 = vmatpush3.bf16.xpose.msk.msra.mxu1 %vm4539_vm3, %v3934_v57  ;;  %3693 = vmatprep.mubr.msk.f32.mxu1 %vm607_vm0, %v1434_v60  ;;  %v1870_v57 = vld [vmem:[%s4994_s15] sm:$0xff]  ;;  %v1873_v60 = vld [vmem:[%s4994_s15 + $0x18] sm:$0xff] }
 0x7f3   : > { %v3980_v59 = vpack.c.bf16 %v1871_v58, %v1870_v57  ;;  %v3394_v57 = vld [vmem:[%s4988_s9 + $0x38] sm:$0xff]  ;;  %v3407_v58 = vld [vmem:[%s4989_s10 + $0x70] sm:$0xff] }
 0x7f9   : > { %3694 = vmatmul.mubr.msk.f32.vlgmr.msra.gmra.mrb[8].mxu1 %vm607_vm0, %v1436_v61  ;;  %v3986_v61 = vpack.c.bf16 %v1873_v60, %v1872_v22  ;;  %v3408_v22 = vld [vmem:[%s4989_s10 + $0x78] sm:$0xff] }
 0x7fa   : > { %v4022_v60 = vpack.c.bf16 %v3408_v22, %v3407_v58  ;;  %v3420_v58 = vld [vmem:[%s4990_s11 + $0x28] sm:$0xff]  ;;  %v3422_v22 = vld [vmem:[%s4990_s11 + $0x38] sm:$0xff] }
 0x8cc   : > { %v3695_v62 = vpop.f32.mrb[8].mxu1 }
 0x8cd   : > { %v1515_v63 = vpop.f32.mrb[9].mxu1  ;;  %v1527_v0 = vsel %vm607_vm0, %v3695_v62, -inf }
 0x8ce   : > { %1528 = vmax.xlane.f32.xlu1 %v1527_v0  ;;  %v1524_v1 = vsel %vm607_vm0, %v1515_v63, -inf }
 0x8cf   : > { %1525 = vmax.xlane.f32.xlu0 %v1524_v1 }
 0x8e5   : > { %4158 = vrot.lane.b32.xlu0 %v4157_v13, %s4253_s23 }
 0x95b   : > { %v1529_v2 = vpop.xlane.xlu1 %1528 }
 0x95c   : > { %v1531_v3 = vsub.f32 %v3695_v62, %v1529_v2  ;;  %v1526_v4 = vpop.xlane.xlu0 %1525  ;;  %v3365_v62 = vld [vmem:[%s4993_s14] ss:$0 sm:$0xff] }
 0x95d   : > { %v1530_v5 = vsub.f32 %v1515_v63, %v1526_v4 }
 0x95e   : > { %v1534_v6 = vmul.f32 1.442695, %v1531_v3 }
 0x95f   : > { %v1532_v7 = vmul.f32 1.442695, %v1530_v5 }
 0x960   : > { %4207 = vpow2.f32 %v1534_v6  ;;  %v4159_v27 = vpop.permute.xlu0 %4158 }
 0x961   : > { %4209 = vpow2.f32 %v1532_v7  ;;  %v4161_v31 = vunpack.i.h.bf16 %v4159_v27  ;;  %v4160_v32 = vunpack.i.l.bf16 %v4159_v27 }
 0x963   : > { %v3950_v34 = vpack.c.bf16 %v4161_v31, %v4160_v32 }
 0x96a   : > { %v4208_v8 = vpop.eup %4207 }
 0x96b   : > { %v1539_v9 = vsel %vm607_vm0, %v4208_v8, 0.0  ;;  %v4210_v10 = vpop.eup %4209 }
 0x96c   : > { %1540 = vadd.xlane.f32.xlu1 %v1539_v9  ;;  %v1536_v11 = vsel %vm607_vm0, %v4210_v10, 0.0 }
 0x970   : > { %1537 = vadd.xlane.f32.xlu1 %v1536_v11 }
 0x981   : > { %4148 = vrot.lane.b32.xlu1 %v4543_v19, %s4254_s1 }
 0x985   : > { %4153 = vrot.lane.b32.xlu1 %v4152_v12, %s4253_s23 }
 0x9f9   : > { %v1541_v15 = vpop.xlane.xlu1 %1540 }
 0x9fa   : > { %4211 = vrcp.f32 %v1541_v15 }
 0x9fd   : > { %v1538_v16 = vpop.xlane.xlu1 %1537 }
 0x9fe   : > { %4213 = vrcp.f32 %v1538_v16 }
 0xa01   : > { %v4149_v14 = vpop.permute.xlu1 %4148 }
 0xa02   : > { %v4151_v18 = vunpack.i.h.bf16 %v4149_v14  ;;  %v4150_v20 = vunpack.i.l.bf16 %v4149_v14 }
 0xa04   : > { %v3940_v23 = vpack.c.bf16 %v4151_v18, %v4150_v20  ;;  %v4212_v19 = vpop.eup %4211 }
 0xa05   : > { %v4154_v24 = vpop.permute.xlu1 %4153  ;;  %v1545_v33 = vmul.f32 %v4212_v19, %v4208_v8 }
 0xa06   : > { %3941 = vmatprep.subr.bf16.mxu1 %v3940_v23  ;;  %v4156_v25 = vunpack.i.h.bf16 %v4154_v24  ;;  %v4155_v26 = vunpack.i.l.bf16 %v4154_v24 }
 0xa07   : > { %3943 = vmatpush3.bf16.msra.mxu1 %v3940_v23 }
 0xa08   : > { %v4214_v28 = vpop.eup %4213  ;;  %v3944_v29 = vpack.c.bf16 %v4156_v25, %v4155_v26  ;;  %v3382_v26 = vld [vmem:[%s4995_s16] ss:$0 sm:$0xff] }
 0xa09   : > { %v1543_v30 = vmul.f32 %v4214_v28, %v4210_v10 }
 0xa0a   : > { %3946 = vmatprep.subr.msk.bf16.mxu1 %vm4539_vm3, %v3944_v29 }
 0xa0b   : > { %3700 = vmatprep.mubr.msk.f32.mxu1 %vm607_vm0, %v1543_v30 }
 0xa0c   : > { %3701 = vmatmul.mubr.msk.f32.vlgmr.msra.gmra.mrb[10].mxu1 %vm607_vm0, %v1545_v33  ;;  %v3401_v33 = vld [vmem:[%s4989_s10 + $0x40] sm:$0xff] }
 0xa10   : > { %3949 = vmatpush3.bf16.xpose.msk.msra.mxu1 %vm4539_vm3, %v3944_v29 }
 0xa11   : > { %3952 = vmatprep.subr.msk.bf16.mxu1 %vm4539_vm3, %v3950_v34 }
 0xa18   : > { %3955 = vmatpush3.bf16.xpose.msk.msra.mxu1 %vm4539_vm3, %v3950_v34  ;;  %v3402_v34 = vld [vmem:[%s4989_s10 + $0x48] sm:$0xff] }
 0xa19   : > { %3982 = vmatprep.subr.msk.bf16.mxu1 %vm4666_vm5, %v3980_v59  ;;  %v4004_v35 = vpack.c.bf16 %v3402_v34, %v3401_v33 }
 0xadf   : > { %v3702_v48 = vpop.f32.mrb[10].mxu1 }
 0xae0   : > { %v1624_v49 = vpop.f32.mrb[11].mxu1 }
 0xae1   : > { %3711 = vmatprep.mubr.msk.f32.mxu1 %vm607_vm0, %v1624_v49 }
 0xae2   : > { %3712 = vmatmul.mubr.msk.f32.vlgmr.msra.gmra.mrb[6].mxu1 %vm607_vm0, %v3702_v48  ;;  %v3404_v48 = vld [vmem:[%s4989_s10 + $0x58] sm:$0xff] }
 0xae3   : > { %3985 = vmatpush3.bf16.xpose.msk.msra.mxu1 %vm4666_vm5, %v3980_v59  ;;  %v4010_v49 = vpack.c.bf16 %v3404_v48, %v3403_v47 }
 0xae4   : > { %3988 = vmatprep.subr.msk.bf16.mxu1 %vm4666_vm5, %v3986_v61 }
 0xaeb   : > { %3991 = vmatpush3.bf16.xpose.msk.msra.mxu1 %vm4666_vm5, %v3986_v61 }
 0xaec   : > { %4006 = vmatprep.subr.msk.bf16.mxu1 %vm4426_vm2, %v4004_v35 }
 0xbb5   : > { %v3713_v51 = vpop.f32.mrb[6].mxu1 }
 0xbb6   : > { %v1721_v54 = vpop.f32.mrb[7].mxu1  ;;  %v4114_v56 = vadd.f32 %v3713_v51, %v1141_v53  ;;  %v3392_v51 = vld [vmem:[%s4988_s9 + $0x28] sm:$0xff] }
 0xbb7   : > { %v4115_v55 = vadd.f32 %v1721_v54, %v1140_v52  ;;  %v3405_v52 = vld [vmem:[%s4989_s10 + $0x60] sm:$0xff]  ;;  %v3992_v53 = vpack.c.bf16 %v3392_v51, %v3391_v50  ;;  %v3406_v54 = vld [vmem:[%s4989_s10 + $0x68] sm:$0xff] }
 0xbb9   : > { %3730 = vmatprep.mubr.msk.f32.mxu0 %vm760_vm1, %v4115_v55  ;;  %3994 = vmatprep.subr.msk.bf16.mxu0 %vm4426_vm2, %v3992_v53 }
 0xbba   : > { %3731 = vmatmul.mubr.msk.f32.vlgmr.msra.gmra.mrb[4].mxu0 %vm760_vm1, %v4114_v56 }
 0xbbb   : > { %3997 = vmatpush3.bf16.xpose.msk.msra.mxu0 %vm4426_vm2, %v3992_v53 }
 0xc8d   : > { %v3732_v63 = vpop.f32.mrb[4].mxu0 }
 0xc8e   : > { %v1849_v0 = vadd.f32 %v3732_v63, %v3365_v62  ;;  %v1843_v1 = vpop.f32.mrb[5].mxu0 }
 0xc8f   : > { %v1844_v2 = vadd.f32 %v3365_v62, %v1843_v1 }
 0xc90   : > { %v1853_v3 = vmul.f32 %v1849_v0, %v1849_v0 }
 0xc91   : > { %v1852_v4 = vmul.f32 %v1844_v2, %v1844_v2 }
 0xc92   : > { %v1855_v5 = vmul.f32 %v1853_v3, %v1849_v0 }
 0xc93   : > { %v1854_v6 = vmul.f32 %v1852_v4, %v1844_v2  ;;  %v3385_v4 = vld [vmem:[%s4984_s5 + $0x1] ss:$0 sm:$0xff] }
 0xc94   : > { %v1857_v7 = vmul.f32 0.044715, %v1855_v5  ;;  %v3389_v5 = vld [vmem:[%s4986_s7 + $0x1] ss:$0 sm:$0xff] }
 0xc95   : > { %v1856_v8 = vmul.f32 0.044715, %v1854_v6 }
 0xc96   : > { %v1859_v9 = vadd.f32 %v1857_v7, %v1849_v0  ;;  %v3386_v7 = vld [vmem:[%s4985_s6 + $0x1] ss:$0 sm:$0xff] }
 0xc97   : > { %v1858_v10 = vadd.f32 %v1856_v8, %v1844_v2  ;;  %v3390_v8 = vld [vmem:[%s4987_s8 + $0x1] ss:$0 sm:$0xff] }
 0xc98   : > { %v1861_v11 = vmul.f32 0.7978846, %v1859_v9 }
 0xc99   : > { %v1860_v12 = vmul.f32 0.7978846, %v1858_v10 }
 0xc9a   : > { %4215 = vtanh.f32 %v1861_v11 }
 0xc9b   : > { %4217 = vtanh.f32 %v1860_v12 }
 0xca4   : > { %v4216_v13 = vpop.eup %4215 }
 0xca5   : > { %v4218_v15 = vpop.eup %4217  ;;  %v1865_v16 = vadd.f32 1.0, %v4216_v13 }
 0xca6   : > { %v1864_v14 = vadd.f32 1.0, %v4218_v15 }
 0xca7   : > { %v1867_v18 = vmul.f32 0.5, %v1865_v16 }
 0xca8   : > { %v1866_v20 = vmul.f32 0.5, %v1864_v14 }
 0xca9   : > { %v1869_v24 = vmul.f32 %v1867_v18, %v1849_v0 }
 0xcaa   : > { %v1868_v23 = vmul.f32 %v1866_v20, %v1844_v2 }
 0xcac   : > { %3741 = vmatprep.mubr.msk.f32.mxu1 %vm1874_vm4, %v1868_v23 }
 0xcad   : > { %3742 = vmatmul.mubr.msk.f32.vlgmr.msra.gmra.mrb[12].mxu1 %vm1874_vm4, %v1869_v24 }
 0xcae   : > { %4009 = vmatpush3.bf16.xpose.msk.msra.mxu1 %vm4426_vm2, %v4004_v35 }
 0xcaf   : > { %4012 = vmatprep.subr.msk.bf16.mxu1 %vm4426_vm2, %v4010_v49 }
 0xcb6   : > { %4015 = vmatpush3.bf16.xpose.msk.msra.mxu1 %vm4426_vm2, %v4010_v49 }
 0xd80   : > { %v3743_v25 = vpop.f32.mrb[12].mxu1 }
 0xd81   : > { %v1969_v27 = vadd.f32 %v4114_v56, %v3743_v25  ;;  %v1959_v19 = vpop.f32.mrb[13].mxu1  ;;  %v3393_v56 = vld [vmem:[%s4988_s9 + $0x30] sm:$0xff] }
 0xd82   : > { %v1968_v28 = vadd.f32 %v4115_v55, %v1959_v19  ;;  %v4016_v55 = vpack.c.bf16 %v3406_v54, %v3405_v52  ;;  %v3998_v59 = vpack.c.bf16 %v3394_v57, %v3393_v56  ;;  %v3419_v57 = vld [vmem:[%s4990_s11 + $0x20] sm:$0xff] }
 0xd83   : > { %v4692_v29 = vadd.f32 %v3382_v26, %v1969_v27 }
 0xd84   : > { %v4694_v30 = vadd.f32 %v3382_v26, %v1968_v28  ;;  %4018 = vmatprep.subr.msk.bf16.mxu1 %vm4426_vm2, %v4016_v55  ;;  %4000 = vmatprep.subr.msk.bf16.mxu0 %vm4426_vm2, %v3998_v59 }
 0xd85   : > { %v1986_v31 = vsel %vm760_vm1, %v4692_v29, 0.0  ;;  %4021 = vmatpush3.bf16.xpose.msk.msra.mxu1 %vm4426_vm2, %v4016_v55  ;;  %4003 = vmatpush3.bf16.xpose.msk.msra.mxu0 %vm4426_vm2, %v3998_v59  ;;  %v3421_v59 = vld [vmem:[%s4990_s11 + $0x30] sm:$0xff] }
 0xd86   : > { %1987 = vadd.xlane.f32.xlu0 %v1986_v31  ;;  %v1983_v32 = vsel %vm760_vm1, %v4694_v30, 0.0  ;;  %4024 = vmatprep.subr.msk.bf16.mxu1 %vm4426_vm2, %v4022_v60 }
 0xd87   : > { %1984 = vadd.xlane.f32.xlu1 %v1983_v32 }
 0xd8d   : > { %4027 = vmatpush3.bf16.xpose.msk.msra.mxu1 %vm4426_vm2, %v4022_v60  ;;  %v4819_v60 = vpack.c.bf16 %v3420_v58, %v3419_v57 }
 0xe13   : > { %v1988_v36 = vpop.xlane.xlu0 %1987 }
 0xe14   : > { %v1990_v37 = vmul.f32 0.03125, %v1988_v36  ;;  %v1985_v38 = vpop.xlane.xlu1 %1984 }
 0xe15   : > { %v1989_v39 = vmul.f32 0.03125, %v1985_v38 }
 0xe16   : > { %v1992_v40 = vsub.f32 %v4692_v29, %v1990_v37 }
 0xe17   : > { %v1991_v42 = vsub.f32 %v4694_v30, %v1989_v39 }
 0xe18   : > { %v1994_v45 = vmul.f32 %v1992_v40, %v1992_v40 }
 0xe19   : > { %v1993_v43 = vmul.f32 %v1991_v42, %v1991_v42 }
 0xe1a   : > { %v1998_v46 = vsel %vm760_vm1, %v1994_v45, 0.0 }
 0xe1b   : > { %v1995_v44 = vsel %vm760_vm1, %v1993_v43, 0.0 }
 0xe1c   : > { %1996 = vadd.xlane.f32.xlu1 %v1995_v44 }
 0xe20   : > { %1999 = vadd.xlane.f32.xlu1 %v1998_v46 }
 0xea9   : > { %v1997_v61 = vpop.xlane.xlu1 %1996 }
 0xeaa   : > { %v2001_v62 = vmul.f32 0.03125, %v1997_v61  ;;  %v4821_v61 = vpack.c.bf16 %v3422_v22, %v3421_v59 }
 0xeac   : > { %v2003_v63 = vadd.f32 1e-05, %v2001_v62 }
 0xead   : > { %v2000_v0 = vpop.xlane.xlu1 %1999 }
 0xeae   : > { %4219 = vrsqrt.f32 %v2003_v63  ;;  %v2002_v1 = vmul.f32 0.03125, %v2000_v0 }
 0xeb0   : > { %v2004_v2 = vadd.f32 1e-05, %v2002_v1 }
 0xeb2   : > { %4221 = vrsqrt.f32 %v2004_v2 }
 0xeb8   : > { %v4220_v3 = vpop.eup %4219 }
 0xeb9   : > { %v2007_v6 = vmul.f32 %v4220_v3, %v1991_v42 }
 0xebb   : > { %v2015_v9 = vmul.f32 %v3385_v4, %v2007_v6  ;;  %v2035_v10 = vmul.f32 %v3389_v5, %v2007_v6 }
 0xebc   : > { %v4222_v11 = vpop.eup %4221 }
 0xebd   : > { %v2008_v12 = vmul.f32 %v4222_v11, %v1992_v40  ;;  %v2023_v13 = vadd.f32 %v3386_v7, %v2015_v9  ;;  %v2043_v15 = vadd.f32 %v3390_v8, %v2035_v10  ;;  %v4182_v9 = vpack.i.bf16 %v3422_v22, %v3421_v59  ;;  %v3118_v10 = vld [vmem:[%s4997_s18] sm:$0xff] }
 0xebf   : > { %v2016_v16 = vmul.f32 %v3385_v4, %v2008_v12  ;;  %3752 = vmatprep.mubr.msk.f32.mxu0 %vm760_vm1, %v2023_v13  ;;  %v2036_v14 = vmul.f32 %v3389_v5, %v2008_v12  ;;  %3771 = vmatprep.mubr.msk.f32.mxu1 %vm760_vm1, %v2043_v15  ;;  %v3120_v12 = vld [vmem:[%s4997_s18 + $0x10] sm:$0xff]  ;;  %v3119_v13 = vld [vmem:[%s4997_s18 + $0x8] sm:$0xff]  ;;  %v3121_v15 = vld [vmem:[%s4997_s18 + $0x18] sm:$0xff] }
 0xec1   : > { %v2024_v18 = vadd.f32 %v3386_v7, %v2016_v16  ;;  %v2044_v20 = vadd.f32 %v3390_v8, %v2036_v14  ;;  %v4177_v8 = vpack.i.bf16 %v3420_v58, %v3419_v57 }
 0xec3   : > { %3753 = vmatmul.mubr.msk.f32.vlgmr.msra.gmra.mrb[6].mxu0 %vm760_vm1, %v2024_v18  ;;  %3772 = vmatmul.mubr.msk.f32.vlgmr.msra.gmra.mrb[14].mxu1 %vm760_vm1, %v2044_v20 }
 0xf96   : > { %v3754_v23 = vpop.f32.mrb[6].mxu0  ;;  %v3773_v24 = vpop.f32.mrb[14].mxu1 }
 0xf97   : > { %v2134_v25 = vpop.f32.mrb[7].mxu0  ;;  %v2250_v26 = vpop.f32.mrb[15].mxu1  ;;  %v2144_v31 = vmul.f32 0.25, %v3754_v23 }
 0xf98   : > { %v2143_v27 = vmul.f32 0.25, %v2134_v25  ;;  %v4028_v19 = vpack.c.bf16 %v3773_v24, %v2250_v26  ;;  %v4780_v28 = vpack.i.bf16 %v3773_v24, %v2250_v26 }
 0xf9a   : > { %4163 = vrot.lane.b32.xlu1 %v4780_v28, %s4253_s23  ;;  %4030 = vmatprep.subr.msk.bf16.mxu0 %vm4539_vm3, %v4028_v19 }
 0xf9b   : > { %2565 = vrot.lane.b32.xlu0 %v2143_v27, %s4253_s23  ;;  %3778 = vmatprep.mubr.msk.f32.mxu0 %vm607_vm0, %v2143_v27 }
 0xf9c   : > { %4033 = vmatpush3.bf16.xpose.msk.msra.mxu0 %vm4539_vm3, %v4028_v19 }
 0xf9e   : > { %2567 = vrot.lane.b32.xlu1 %v2144_v31, %s4253_s23 }
 0xfa3   : > { %3779 = vmatmul.mubr.msk.f32.vlgmr.msra.gmra.mrb[8].mxu0 %vm607_vm0, %v2144_v31 }
0x100c   : > { %v4164_v32 = vpop.permute.xlu1 %4163 }
0x100d   : > { %v4166_v33 = vunpack.i.h.bf16 %v4164_v32  ;;  %v4165_v34 = vunpack.i.l.bf16 %v4164_v32  ;;  %v2566_v35 = vpop.permute.xlu0 %2565 }
0x100e   : > { %3803 = vmatprep.mubr.msk.f32.mxu1 %vm607_vm0, %v2566_v35 }
0x100f   : > { %v4050_v36 = vpack.c.bf16 %v4166_v33, %v4165_v34 }
0x1010   : > { %v2568_v37 = vpop.permute.xlu1 %2567 }
0x1011   : > { %4052 = vmatprep.subr.msk.bf16.mxu1 %vm4539_vm3, %v4050_v36 }
0x1012   : > { %4055 = vmatpush3.bf16.xpose.msk.msra.mxu1 %vm4539_vm3, %v4050_v36 }
0x1019   : > { %3804 = vmatmul.mubr.msk.f32.vlgmr.msra.gmra.mrb[16].mxu1 %vm607_vm0, %v2568_v37 }
0x1076   : > { %v3780_v38 = vpop.f32.mrb[8].mxu0 }
0x1077   : > { %v2352_v39 = vpop.f32.mrb[9].mxu0  ;;  %v2364_v40 = vsel %vm607_vm0, %v3780_v38, -inf }
0x1078   : > { %2365 = vmax.xlane.f32.xlu0 %v2364_v40  ;;  %v2361_v42 = vsel %vm607_vm0, %v2352_v39, -inf }
0x1079   : > { %2362 = vmax.xlane.f32.xlu1 %v2361_v42 }
0x10ec   : > { %v3805_v43 = vpop.f32.mrb[16].mxu1 }
0x10ed   : > { %v2647_v44 = vpop.f32.mrb[17].mxu1  ;;  %v2659_v45 = vsel %vm607_vm0, %v3805_v43, -inf }
0x10ee   : > { %2660 = vmax.xlane.f32.xlu0 %v2659_v45  ;;  %v2656_v46 = vsel %vm607_vm0, %v2647_v44, -inf  ;;  %v3450_v45 = vld [vmem:[%s4992_s13 + $0x48] sm:$0xff] }
0x10ef   : > { %2657 = vmax.xlane.f32.xlu1 %v2656_v46  ;;  %v3451_v46 = vld [vmem:[%s4992_s13 + $0x50] sm:$0xff] }
0x1105   : > { %v2366_v47 = vpop.xlane.xlu0 %2365 }
0x1106   : > { %v2368_v48 = vsub.f32 %v3780_v38, %v2366_v47  ;;  %v2363_v49 = vpop.xlane.xlu1 %2362 }
0x1107   : > { %v2367_v50 = vsub.f32 %v2352_v39, %v2363_v49 }
0x1108   : > { %v2371_v51 = vmul.f32 1.442695, %v2368_v48  ;;  %v3452_v48 = vld [vmem:[%s4992_s13 + $0x58] sm:$0xff] }
0x1109   : > { %v2369_v52 = vmul.f32 1.442695, %v2367_v50  ;;  %v4078_v49 = vpack.c.bf16 %v3452_v48, %v3451_v46  ;;  %v3453_v50 = vld [vmem:[%s4992_s13 + $0x60] sm:$0xff]  ;;  %v3115_v46 = vld [vmem:[%s4996_s17 + $0x8] sm:$0xff]  ;;  %v3117_v48 = vld [vmem:[%s4996_s17 + $0x18] sm:$0xff] }
0x110a   : > { %4223 = vpow2.f32 %v2371_v51  ;;  %v3454_v51 = vld [vmem:[%s4992_s13 + $0x68] sm:$0xff] }
0x110b   : > { %4225 = vpow2.f32 %v2369_v52  ;;  %v4084_v52 = vpack.c.bf16 %v3454_v51, %v3453_v50 }
0x1114   : > { %v4802_v53 = vpop.eup %4223 }
0x1115   : > { %v4226_v54 = vpop.eup %4225  ;;  %v2376_v55 = vsel %vm607_vm0, %v4802_v53, 0.0 }
0x1116   : > { %2377 = vadd.xlane.f32.xlu0 %v2376_v55  ;;  %v2373_v56 = vsel %vm607_vm0, %v4226_v54, 0.0 }
0x1117   : > { %2374 = vadd.xlane.f32.xlu1 %v2373_v56 }
0x117b   : > { %v2661_v62 = vpop.xlane.xlu0 %2660 }
0x117c   : > { %v2663_v63 = vsub.f32 %v3805_v43, %v2661_v62  ;;  %v2658_v0 = vpop.xlane.xlu1 %2657 }
0x117d   : > { %v2662_v1 = vsub.f32 %v2647_v44, %v2658_v0  ;;  %v3449_v44 = vld [vmem:[%s4992_s13 + $0x40] sm:$0xff] }
0x117e   : > { %v2666_v2 = vmul.f32 1.442695, %v2663_v63  ;;  %v4072_v47 = vpack.c.bf16 %v3450_v45, %v3449_v44  ;;  %v3424_v63 = vld [vmem:[%s4991_s12 + $0x1] ss:$0 sm:$0xff] }
0x117f   : > { %v2664_v3 = vmul.f32 1.442695, %v2662_v1  ;;  %v2272_v1 = vadd.f32 %v3424_v63, %v4694_v30  ;;  %v3472_v30 = vld [vmem:[%s4994_s15 + $0x38] sm:$0xff] }
0x1180   : > { %4227 = vpow2.f32 %v2666_v2  ;;  %v2273_v2 = vadd.f32 %v3424_v63, %v4692_v29  ;;  %v3471_v29 = vld [vmem:[%s4994_s15 + $0x30] sm:$0xff] }
0x1181   : > { %4229 = vpow2.f32 %v2664_v3 }
0x118a   : > { %v4228_v4 = vpop.eup %4227 }
0x118b   : > { %v4230_v5 = vpop.eup %4229  ;;  %v2671_v6 = vsel %vm607_vm0, %v4228_v4, 0.0 }
0x118c   : > { %2672 = vadd.xlane.f32.xlu0 %v2671_v6  ;;  %v2668_v7 = vsel %vm607_vm0, %v4230_v5, 0.0  ;;  %v3470_v6 = vld [vmem:[%s4994_s15 + $0x28] sm:$0xff] }
0x118d   : > { %2669 = vadd.xlane.f32.xlu1 %v2668_v7  ;;  %v4096_v7 = vpack.c.bf16 %v3470_v6, %v3469_v17 }
0x119e   : > { %4168 = vrot.lane.b32.xlu1 %v4780_v28, %s4252_s2 }
0x11a2   : > { %4173 = vrot.lane.b32.xlu0 %v4780_v28, %s4254_s1  ;;  %4178 = vrot.lane.b32.xlu1 %v4177_v8, %s4253_s23  ;;  %v4102_v8 = vpack.c.bf16 %v3472_v30, %v3471_v29 }
0x11a3   : > { %v2378_v18 = vpop.xlane.xlu0 %2377 }
0x11a4   : > { %v2375_v11 = vpop.xlane.xlu1 %2374 }
0x11a5   : > { %4231 = vrcp.f32 %v2375_v11 }
0x11a6   : > { %3124 = vperm.xlu0 %4135, %v3118_v10   ;;  %4183 = vrot.lane.b32.xlu1 %v4182_v9, %s4253_s23  ;;  %4233 = vrcp.f32 %v2378_v18  ;;  %v3458_v9 = vld [vmem:[%s4993_s14 + $0x1] ss:$0 sm:$0xff] }
0x11aa   : > { %3134 = vperm.xlu0 %4135, %v3120_v12   ;;  %3129 = vperm.xlu1 %4136, %v3119_v13  }
0x11ae   : > { %3139 = vperm.xlu1 %4136, %v3121_v15  }
0x11af   : > { %v4232_v16 = vpop.eup %4231 }
0x11b0   : > { %v2380_v14 = vmul.f32 %v4232_v16, %v4226_v54  ;;  %v4234_v33 = vpop.eup %4233  ;;  %v3456_v54 = vld [vmem:[%s4992_s13 + $0x78] sm:$0xff] }
0x11b1   : > { %v2382_v36 = vmul.f32 %v4234_v33, %v4802_v53  ;;  %v3455_v53 = vld [vmem:[%s4992_s13 + $0x70] sm:$0xff] }
0x11b2   : > { %3785 = vmatprep.mubr.msk.f32.mxu0 %vm607_vm0, %v2380_v14  ;;  %v4090_v55 = vpack.c.bf16 %v3456_v54, %v3455_v53 }
0x1219   : > { %v2673_v20 = vpop.xlane.xlu0 %2672 }
0x121a   : > { %4235 = vrcp.f32 %v2673_v20  ;;  %v2670_v23 = vpop.xlane.xlu1 %2669 }
0x121b   : > { %4237 = vrcp.f32 %v2670_v23 }
0x121d   : > { %v4174_v24 = vpop.permute.xlu0 %4173 }
0x121e   : > { %v4176_v25 = vunpack.i.h.bf16 %v4174_v24  ;;  %v4175_v26 = vunpack.i.l.bf16 %v4174_v24  ;;  %v4169_v27 = vpop.permute.xlu1 %4168 }
0x121f   : > { %v4171_v19 = vunpack.i.h.bf16 %v4169_v27  ;;  %v4170_v28 = vunpack.i.l.bf16 %v4169_v27 }
0x1220   : > { %v4056_v31 = vpack.c.bf16 %v4176_v25, %v4175_v26 }
0x1221   : > { %v4034_v32 = vpack.c.bf16 %v4171_v19, %v4170_v28 }
0x1222   : > { %4057 = vmatprep.subr.bf16.mxu1 %v4056_v31  ;;  %v4179_v39 = vpop.permute.xlu1 %4178 }
0x1223   : > { %4035 = vmatprep.subr.bf16.mxu0 %v4034_v32  ;;  %4059 = vmatpush3.bf16.msra.mxu1 %v4056_v31  ;;  %v4181_v40 = vunpack.i.h.bf16 %v4179_v39  ;;  %v4180_v42 = vunpack.i.l.bf16 %v4179_v39 }
0x1224   : > { %v4236_v34 = vpop.eup %4235  ;;  %4037 = vmatpush3.bf16.msra.mxu0 %v4034_v32  ;;  %4074 = vmatprep.subr.msk.bf16.mxu1 %vm4426_vm2, %v4072_v47 }
0x1225   : > { %v4238_v35 = vpop.eup %4237  ;;  %4040 = vmatprep.subr.msk.bf16.mxu0 %vm4539_vm3, %v4819_v60  ;;  %v2677_v38 = vmul.f32 %v4236_v34, %v4228_v4  ;;  %v4060_v43 = vpack.c.bf16 %v4181_v40, %v4180_v42 }
0x1226   : > { %v2675_v37 = vmul.f32 %v4238_v35, %v4230_v5  ;;  %v4184_v56 = vpop.permute.xlu1 %4183 }
0x1227   : > { %3786 = vmatmul.mubr.msk.f32.vlgmr.msra.gmra.mrb[10].mxu0 %vm607_vm0, %v2382_v36  ;;  %v4186_v57 = vunpack.i.h.bf16 %v4184_v56  ;;  %v4185_v58 = vunpack.i.l.bf16 %v4184_v56  ;;  %v3114_v36 = vld [vmem:[%s4996_s17] sm:$0xff] }
0x1228   : > { %3810 = vmatprep.mubr.msk.f32.mxu1 %vm607_vm0, %v2675_v37 }
0x1229   : > { %3811 = vmatmul.mubr.msk.f32.vlgmr.msra.gmra.mrb[18].mxu1 %vm607_vm0, %v2677_v38  ;;  %v4066_v22 = vpack.c.bf16 %v4186_v57, %v4185_v58  ;;  %v3480_v38 = vld [vmem:[%s4995_s16 + $0x1] ss:$0 sm:$0xff] }
0x122a   : > { %v3130_v41 = vpop.permute.xlu1 %3129 }
0x122c   : > { %4077 = vmatpush3.bf16.xpose.msk.msra.mxu1 %vm4426_vm2, %v4072_v47  ;;  %v3116_v47 = vld [vmem:[%s4996_s17 + $0x10] sm:$0xff] }
0x122d   : > { %4043 = vmatpush3.bf16.xpose.msk.msra.mxu0 %vm4539_vm3, %v4819_v60  ;;  %4080 = vmatprep.subr.msk.bf16.mxu1 %vm4426_vm2, %v4078_v49 }
0x122e   : > { %4046 = vmatprep.subr.msk.bf16.mxu0 %vm4539_vm3, %v4821_v61  ;;  %v3140_v54 = vpop.permute.xlu1 %3139 }
0x1234   : > { %4083 = vmatpush3.bf16.xpose.msk.msra.mxu1 %vm4426_vm2, %v4078_v49  ;;  %v3125_v49 = vpop.permute.xlu0 %3124 }
0x1235   : > { %4049 = vmatpush3.bf16.xpose.msk.msra.mxu0 %vm4539_vm3, %v4821_v61  ;;  %4086 = vmatprep.subr.msk.bf16.mxu1 %vm4426_vm2, %v4084_v52 }
0x1236   : > { %4062 = vmatprep.subr.msk.bf16.mxu0 %vm4539_vm3, %v4060_v43 }
0x1238   : > { %v3135_v56 = vpop.permute.xlu0 %3134 }
0x123c   : > { %4089 = vmatpush3.bf16.xpose.msk.msra.mxu1 %vm4426_vm2, %v4084_v52 }
0x123d   : > { %4092 = vmatprep.subr.msk.bf16.mxu1 %vm4426_vm2, %v4090_v55 }
0x1244   : > { %4095 = vmatpush3.bf16.xpose.msk.msra.mxu1 %vm4426_vm2, %v4090_v55 }
0x12fa   : > { %v3787_v59 = vpop.f32.mrb[10].mxu0 }
0x12fb   : > { %v2461_v60 = vpop.f32.mrb[11].mxu0 }
0x12fc   : > { %3796 = vmatprep.mubr.msk.f32.mxu0 %vm607_vm0, %v2461_v60  ;;  %v3812_v61 = vpop.f32.mrb[18].mxu1 }
0x12fd   : > { %3797 = vmatmul.mubr.msk.f32.vlgmr.msra.gmra.mrb[12].mxu0 %vm607_vm0, %v3787_v59  ;;  %v2756_v62 = vpop.f32.mrb[19].mxu1 }
0x12fe   : > { %4065 = vmatpush3.bf16.xpose.msk.msra.mxu0 %vm4539_vm3, %v4060_v43  ;;  %3821 = vmatprep.mubr.msk.f32.mxu0 %vm607_vm0, %v2756_v62 }
0x12ff   : > { %4068 = vmatprep.subr.msk.bf16.mxu0 %vm4539_vm3, %v4066_v22 }
0x1306   : > { %4071 = vmatpush3.bf16.xpose.msk.msra.mxu0 %vm4539_vm3, %v4066_v22 }
0x1307   : > { %4098 = vmatprep.subr.msk.bf16.mxu0 %vm4666_vm5, %v4096_v7 }
0x130d   : > { %3822 = vmatmul.mubr.msk.f32.vlgmr.msra.gmra.mrb[12].mxu0 %vm607_vm0, %v3812_v61 }
0x130e   : > { %4101 = vmatpush3.bf16.xpose.msk.msra.mxu0 %vm4666_vm5, %v4096_v7 }
0x130f   : > { %4104 = vmatprep.subr.msk.bf16.mxu0 %vm4666_vm5, %v4102_v8 }
0x1316   : > { %4107 = vmatpush3.bf16.xpose.msk.msra.mxu0 %vm4666_vm5, %v4102_v8 }
0x13e0   : > { %v3823_v0 = vpop.f32.mrb[12].mxu0 }
0x13e1   : > { %v2853_v3 = vpop.f32.mrb[13].mxu0  ;;  %v4116_v5 = vadd.f32 %v3823_v0, %v2273_v2 }
0x13e2   : > { %v4117_v4 = vadd.f32 %v2853_v3, %v2272_v1 }
0x13e4   : > { %3840 = vmatprep.mubr.msk.f32.mxu1 %vm760_vm1, %v4117_v4 }
0x13e5   : > { %3841 = vmatmul.mubr.msk.f32.vlgmr.msra.gmra.mrb[20].mxu1 %vm760_vm1, %v4116_v5 }
0x14b8   : > { %v3842_v10 = vpop.f32.mrb[20].mxu1 }
0x14b9   : > { %v2983_v11 = vadd.f32 %v3842_v10, %v3458_v9  ;;  %v2977_v12 = vpop.f32.mrb[21].mxu1 }
0x14ba   : > { %v2978_v13 = vadd.f32 %v3458_v9, %v2977_v12 }
0x14bb   : > { %v2987_v15 = vmul.f32 %v2983_v11, %v2983_v11 }
0x14bc   : > { %v2986_v16 = vmul.f32 %v2978_v13, %v2978_v13 }
0x14bd   : > { %v2989_v14 = vmul.f32 %v2987_v15, %v2983_v11 }
0x14be   : > { %v2988_v18 = vmul.f32 %v2986_v16, %v2978_v13 }
0x14bf   : > { %v2991_v20 = vmul.f32 0.044715, %v2989_v14 }
0x14c0   : > { %v2990_v23 = vmul.f32 0.044715, %v2988_v18 }
0x14c1   : > { %v2993_v24 = vadd.f32 %v2991_v20, %v2983_v11 }
0x14c2   : > { %v2992_v25 = vadd.f32 %v2990_v23, %v2978_v13 }
0x14c3   : > { %v2995_v26 = vmul.f32 0.7978846, %v2993_v24 }
0x14c4   : > { %v2994_v27 = vmul.f32 0.7978846, %v2992_v25 }
0x14c5   : > { %4239 = vtanh.f32 %v2995_v26 }
0x14c6   : > { %4241 = vtanh.f32 %v2994_v27 }
0x14cf   : > { %v4240_v21 = vpop.eup %4239 }
0x14d0   : > { %v4242_v19 = vpop.eup %4241  ;;  %v2999_v28 = vadd.f32 1.0, %v4240_v21 }
0x14d1   : > { %v2998_v31 = vadd.f32 1.0, %v4242_v19 }
0x14d2   : > { %v3001_v32 = vmul.f32 0.5, %v2999_v28 }
0x14d3   : > { %v3000_v33 = vmul.f32 0.5, %v2998_v31 }
0x14d4   : > { %v3003_v35 = vmul.f32 %v3001_v32, %v2983_v11 }
0x14d5   : > { %v3002_v34 = vmul.f32 %v3000_v33, %v2978_v13 }
0x14d7   : > { %3851 = vmatprep.mubr.msk.f32.mxu0 %vm1874_vm4, %v3002_v34 }
0x14d8   : > { %3852 = vmatmul.mubr.msk.f32.vlgmr.msra.gmra.mrb[14].mxu0 %vm1874_vm4, %v3003_v35 }
0x14d9   : > { %3858 = vmatprep.mubr.msk.f32.mxu0 %vm760_vm1, %v3114_v36 }
0x15ab   : > { %v3853_v37 = vpop.f32.mrb[14].mxu0 }
0x15ac   : > { %v3103_v39 = vadd.f32 %v4116_v5, %v3853_v37  ;;  %v3093_v40 = vpop.f32.mrb[15].mxu0 }
0x15ad   : > { %v3102_v42 = vadd.f32 %v4117_v4, %v3093_v40 }
0x15ae   : > { %v3113_v43 = vadd.f32 %v3480_v38, %v3103_v39 }
0x15af   : > { %v3112_v44 = vadd.f32 %v3480_v38, %v3102_v42 }
0x15b1   : > { %v4108_v45 = vpack.c.bf16 %v3113_v43, %v3112_v44 }
0x15b3   : > { %4110 = vmatprep.subr.msk.bf16.mxu0 %vm4426_vm2, %v4108_v45 }
0x15b4   : > { %4113 = vmatpush3.bf16.xpose.msk.msra.mxu0 %vm4426_vm2, %v4108_v45 }
0x15bb   : > { %3859 = vmatmul.mubr.msk.f32.vlgmr.msra.gmra.mrb[16].mxu0 %vm760_vm1, %v3115_v46 }
0x15bc   : > { %3861 = vmatprep.mubr.msk.f32.mxu0 %vm760_vm1, %v3116_v47 }
0x15bf   : > { %3862 = vmatmul.mubr.msk.f32.gmra.mrb[18].mxu0 %vm760_vm1, %v3117_v48 }
0x168e   : > { %v3860_v50 = vpop.f32.mrb[16].mxu0 }
0x168f   : > { %v3232_v51 = vadd.f32 %v3860_v50, %v3130_v41  ;;  %v3226_v52 = vpop.f32.mrb[17].mxu0 }
0x1690   : > { %v3227_v53 = vadd.f32 %v3226_v52, %v3125_v49 }
0x1691   : > { %3246 = vst.msk [vmem:[%s602_s20 + $0x8] sm:$0xff] %vm607_vm0, %v3232_v51 }
0x1692   : > { %3245 = vst.msk [vmem:[%s602_s20] sm:$0xff] %vm607_vm0, %v3227_v53  ;;  %v3863_v55 = vpop.f32.mrb[18].mxu0 }
0x1693   : > { %v3242_v57 = vadd.f32 %v3863_v55, %v3140_v54  ;;  %v3236_v58 = vpop.f32.mrb[19].mxu0 }
0x1694   : > { %v3237_v59 = vadd.f32 %v3236_v58, %v3135_v56 }
0x1695   : > { %3248 = vst.msk [vmem:[%s602_s20 + $0x18] sm:$0xff] %vm607_vm0, %v3242_v57 }
0x1696   : > { %3247 = vst.msk [vmem:[%s602_s20 + $0x10] sm:$0xff] %vm607_vm0, %v3237_v59 }
0x1697 PF: > { %s29_s0 = sadd.s32 1, %s4249_s0  }
0x1698   : > { %p26_p4 = scmp.ge.s32.totalorder %s29_s0, 4  }
0x169a   :  { %28 = sbr.rel (!%p26_p4) target bundleno = 6 (0x6), region = 138 }

</bundles_post_ra>
